<compile_context>
chip_gen: v7x
topology: tpu7x:2x2x1
jax: 0.10.0
libtpu: 0.0.40
codegen_flags: <defaults>
</compile_context>

<pallas_src>
import numpy as np
import jax
import jax.numpy as jnp
from jax import lax
from jax.experimental import pallas as pl
from jax.experimental.pallas import tpu as pltpu

# ---- shapes (mirroring the PyTorch module config) ---------------------------
V, E = 50, 300          # vocab size, embedding dim (300 fixed by the module)
B, T = 2, 8             # batch, sequence length
H = 32                  # hidden_size
C = 4                   # num_class

# ---- padded, lane/sublane-dense kernel shapes -------------------------------
Bp = 8                  # batch padded to sublane count
Hp = 128                # each gate padded to one full lane group
G = 3 * Hp              # r | z | n gate blocks, each 128 wide
Cp = 128                # output lanes padded to 128


# ---- Pallas kernel ----------------------------------------------------------
def gru_classifier_kernel(tok_ref, emb_ref, wih_ref, whh_ref, bih_ref,
                          bhh_ref, wfc_ref, bfc_ref, out_ref):
    # tok_ref: (T*Bp, 1) int32   time-major flattened token ids
    # emb_ref: (V, E)            embedding table
    # wih_ref: (E, G)            input->gates weights (zero-padded per gate)
    # whh_ref: (Hp, G)           hidden->gates weights (zero-padded)
    # bih_ref: (1, G)  bhh_ref: (1, G)
    # wfc_ref: (Hp, Cp)  bfc_ref: (1, Cp)
    # out_ref: (Bp, Cp)

    # --- in-kernel embedding gather via one-hot matmul (no dynamic gather) ---
    onehot = (lax.broadcasted_iota(jnp.int32, (T * Bp, V), 1)
              == tok_ref[...]).astype(jnp.float32)                  # (T*Bp, V)
    x_all = jnp.dot(onehot, emb_ref[...],
                    preferred_element_type=jnp.float32)             # (T*Bp, E)

    # --- hoisted input projection: one big matmul, b_ih folded in ------------
    gx_all = jnp.dot(x_all, wih_ref[...],
                     preferred_element_type=jnp.float32) + bih_ref[...]  # (T*Bp, G)

    whh = whh_ref[...]
    bhh = bhh_ref[...]

    h = jnp.zeros((Bp, Hp), jnp.float32)
    acc = jnp.zeros((Bp, Hp), jnp.float32)

    # --- statically unrolled recurrence (T = 8) -------------------------------
    for t in range(T):
        gx = gx_all[t * Bp:(t + 1) * Bp, :]                          # (Bp, G) static slice
        gh = jnp.dot(h, whh, preferred_element_type=jnp.float32) + bhh  # (Bp, G)
        # PyTorch GRU gate order: r, z, n ; n-gate keeps b_hh inside r*(...)
        r = jax.nn.sigmoid(gx[:, 0:Hp]        + gh[:, 0:Hp])
        z = jax.nn.sigmoid(gx[:, Hp:2 * Hp]   + gh[:, Hp:2 * Hp])
        n = jnp.tanh(gx[:, 2 * Hp:3 * Hp] + r * gh[:, 2 * Hp:3 * Hp])
        h = (1.0 - z) * n + z * h
        acc = acc + h

    embed = acc * (1.0 / T)                                          # mean pool
    out_ref[...] = (jnp.dot(embed, wfc_ref[...],
                            preferred_element_type=jnp.float32) + bfc_ref[...])


# ---- wrapper: builds padded, lane-dense parameter layouts (pure glue) -------
def seq_classifier_forward(tokens, emb_table, w_ih, w_hh, b_ih, b_hh, w_fc, b_fc):
    def pad_gate_cols(w):
        # w: (rows, 3H) -> (rows, 3*Hp) with each H-wide gate placed at the
        # start of its own 128-lane block; pad columns are zero.
        out = jnp.zeros((w.shape[0], G), jnp.float32)
        for g in range(3):
            out = out.at[:, g * Hp:g * Hp + H].set(w[:, g * H:(g + 1) * H])
        return out

    wih_p = pad_gate_cols(w_ih.T.astype(jnp.float32))                      # (E, G)
    whh_p = jnp.zeros((Hp, G), jnp.float32).at[:H].set(
        pad_gate_cols(w_hh.T.astype(jnp.float32)))                         # (Hp, G)
    bih_p = pad_gate_cols(b_ih[None, :].astype(jnp.float32))               # (1, G)
    bhh_p = pad_gate_cols(b_hh[None, :].astype(jnp.float32))               # (1, G)
    wfc_p = jnp.zeros((Hp, Cp), jnp.float32).at[:H, :C].set(
        w_fc.T.astype(jnp.float32))                                        # (Hp, Cp)
    bfc_p = jnp.zeros((1, Cp), jnp.float32).at[0, :C].set(
        b_fc.astype(jnp.float32))                                          # (1, Cp)

    tok_p = jnp.zeros((Bp, T), jnp.int32).at[:B].set(tokens.astype(jnp.int32))
    tok_tm = tok_p.T.reshape(T * Bp, 1)                                    # time-major

    vm = pl.BlockSpec(memory_space=pltpu.MemorySpace.VMEM)
    out_padded = pl.pallas_call(
        gru_classifier_kernel,
        out_shape=jax.ShapeDtypeStruct((Bp, Cp), jnp.float32),
        in_specs=[vm] * 8,
        out_specs=vm,
    )(tok_tm, emb_table.astype(jnp.float32),
      wih_p, whh_p, bih_p, bhh_p, wfc_p, bfc_p)

    return out_padded[:B, :C]


# ---- pure-JAX reference (PyTorch GRU semantics, unpadded) -------------------
def reference_forward(tokens, emb_table, w_ih, w_hh, b_ih, b_hh, w_fc, b_fc):
    x = emb_table[tokens]                    # (B, T, E)
    h = jnp.zeros((B, H), jnp.float32)
    outs = []
    for t in range(T):
        gx = x[:, t, :] @ w_ih.T + b_ih
        gh = h @ w_hh.T + b_hh
        r = jax.nn.sigmoid(gx[:, :H] + gh[:, :H])
        z = jax.nn.sigmoid(gx[:, H:2 * H] + gh[:, H:2 * H])
        n = jnp.tanh(gx[:, 2 * H:] + r * gh[:, 2 * H:])
        h = (1.0 - z) * n + z * h
        outs.append(h)
    embed = jnp.stack(outs, axis=1).mean(axis=1)
    return embed @ w_fc.T + b_fc


if __name__ == "__main__":
    key = jax.random.PRNGKey(0)
    k_emb, k_ih, k_hh, k_bih, k_bhh, k_fc, k_bfc, k_tok = jax.random.split(key, 8)

    s = 1.0 / np.sqrt(H)
    emb_table = jax.random.normal(k_emb, (V, E), jnp.float32)
    w_ih = jax.random.uniform(k_ih,  (3 * H, E), jnp.float32, -s, s)
    w_hh = jax.random.uniform(k_hh,  (3 * H, H), jnp.float32, -s, s)
    b_ih = jax.random.uniform(k_bih, (3 * H,),   jnp.float32, -s, s)
    b_hh = jax.random.uniform(k_bhh, (3 * H,),   jnp.float32, -s, s)
    w_fc = jax.random.uniform(k_fc,  (C, H),     jnp.float32, -s, s)
    b_fc = jax.random.uniform(k_bfc, (C,),       jnp.float32, -s, s)

    tokens = jax.random.randint(k_tok, (B, T), 0, V, dtype=jnp.int32)

    logits = seq_classifier_forward(tokens, emb_table, w_ih, w_hh,
                                    b_ih, b_hh, w_fc, b_fc)
    logits = jax.block_until_ready(logits)

    ref = jax.block_until_ready(
        reference_forward(tokens, emb_table, w_ih, w_hh, b_ih, b_hh, w_fc, b_fc))

    np.testing.assert_allclose(np.asarray(logits), np.asarray(ref),
                               rtol=2e-2, atol=2e-2)

    # TODO(synk): embed_type='learnt' (Conv1d(25,1,1) over time), 'sum'/'last'
    # pooling, bidirectional / multi-layer, and LSTM/RNN model variants are not
    # exercised by this config (GRU, mean, 1 layer, unidirectional).
    print("KERNEL_OK")
</pallas_src>

<mosaic_0001>
module attributes {stable_mosaic.version = 11 : i64} {
  func.func @gru_classifier_kernel(%arg0: memref<64x1xi32, #tpu.memory_space<vmem>>, %arg1: memref<50x300xf32, #tpu.memory_space<vmem>>, %arg2: memref<300x384xf32, #tpu.memory_space<vmem>>, %arg3: memref<128x384xf32, #tpu.memory_space<vmem>>, %arg4: memref<1x384xf32, #tpu.memory_space<vmem>>, %arg5: memref<1x384xf32, #tpu.memory_space<vmem>>, %arg6: memref<128x128xf32, #tpu.memory_space<vmem>>, %arg7: memref<1x128xf32, #tpu.memory_space<vmem>>, %arg8: memref<8x128xf32, #tpu.memory_space<vmem>>) attributes {dimension_semantics = [], scalar_prefetch = 0 : i64, scratch_operands = 0 : i64, tpu.core_type = #tpu.core_type<tc>} {
    %0 = tpu.iota {dimensions = array<i32: 1>} : vector<64x50xi32>
    %c0 = arith.constant 0 : index
    %c0_0 = arith.constant 0 : index
    %1 = vector.load %arg0[%c0, %c0_0] : memref<64x1xi32, #tpu.memory_space<vmem>>, vector<64x1xi32>
    %2 = vector.broadcast %1 : vector<64x1xi32> to vector<64x50xi32>
    %3 = arith.cmpi eq, %0, %2 : vector<64x50xi32>
    %4 = arith.extui %3 : vector<64x50xi1> to vector<64x50xi32>
    %5 = arith.sitofp %4 : vector<64x50xi32> to vector<64x50xf32>
    %c0_1 = arith.constant 0 : index
    %c0_2 = arith.constant 0 : index
    %6 = vector.load %arg1[%c0_1, %c0_2] : memref<50x300xf32, #tpu.memory_space<vmem>>, vector<50x300xf32>
    %cst = arith.constant dense<0.000000e+00> : vector<64x300xf32>
    %7 = tpu.matmul %5, %6, %cst {dimension_numbers = #tpu.dot_dimension_numbers<[1], [0], [0], [1], [0, 0, 1, 1], [], []>} : vector<64x50xf32>, vector<50x300xf32>, vector<64x300xf32> -> vector<64x300xf32>
    %c0_3 = arith.constant 0 : index
    %c0_4 = arith.constant 0 : index
    %8 = vector.load %arg2[%c0_3, %c0_4] : memref<300x384xf32, #tpu.memory_space<vmem>>, vector<300x384xf32>
    %cst_5 = arith.constant dense<0.000000e+00> : vector<64x384xf32>
    %9 = tpu.matmul %7, %8, %cst_5 {dimension_numbers = #tpu.dot_dimension_numbers<[1], [0], [0], [1], [0, 0, 1, 1], [], []>} : vector<64x300xf32>, vector<300x384xf32>, vector<64x384xf32> -> vector<64x384xf32>
    %c0_6 = arith.constant 0 : index
    %c0_7 = arith.constant 0 : index
    %10 = vector.load %arg4[%c0_6, %c0_7] : memref<1x384xf32, #tpu.memory_space<vmem>>, vector<1x384xf32>
    %11 = vector.broadcast %10 : vector<1x384xf32> to vector<64x384xf32>
    %12 = arith.addf %9, %11 : vector<64x384xf32>
    %c0_8 = arith.constant 0 : index
    %c0_9 = arith.constant 0 : index
    %13 = vector.load %arg3[%c0_8, %c0_9] : memref<128x384xf32, #tpu.memory_space<vmem>>, vector<128x384xf32>
    %c0_10 = arith.constant 0 : index
    %c0_11 = arith.constant 0 : index
    %14 = vector.load %arg5[%c0_10, %c0_11] : memref<1x384xf32, #tpu.memory_space<vmem>>, vector<1x384xf32>
    %cst_12 = arith.constant 0.000000e+00 : f32
    %15 = vector.broadcast %cst_12 : f32 to vector<8x128xf32>
    %cst_13 = arith.constant 0.000000e+00 : f32
    %16 = vector.broadcast %cst_13 : f32 to vector<8x128xf32>
    %17 = vector.extract_strided_slice %12 {offsets = [0, 0], sizes = [8, 384], strides = [1, 1]} : vector<64x384xf32> to vector<8x384xf32>
    %cst_14 = arith.constant dense<0.000000e+00> : vector<8x384xf32>
    %18 = tpu.matmul %15, %13, %cst_14 {dimension_numbers = #tpu.dot_dimension_numbers<[1], [0], [0], [1], [0, 0, 1, 1], [], []>} : vector<8x128xf32>, vector<128x384xf32>, vector<8x384xf32> -> vector<8x384xf32>
    %19 = vector.broadcast %14 : vector<1x384xf32> to vector<8x384xf32>
    %20 = arith.addf %18, %19 : vector<8x384xf32>
    %21 = vector.extract_strided_slice %17 {offsets = [0, 0], sizes = [8, 128], strides = [1, 1]} : vector<8x384xf32> to vector<8x128xf32>
    %22 = vector.extract_strided_slice %20 {offsets = [0, 0], sizes = [8, 128], strides = [1, 1]} : vector<8x384xf32> to vector<8x128xf32>
    %23 = arith.addf %21, %22 : vector<8x128xf32>
    %24 = arith.negf %23 : vector<8x128xf32>
    %25 = math.exp %24 : vector<8x128xf32>
    %cst_15 = arith.constant 1.000000e+00 : f32
    %26 = vector.broadcast %cst_15 : f32 to vector<8x128xf32>
    %27 = arith.addf %26, %25 : vector<8x128xf32>
    %28 = arith.divf %26, %27 : vector<8x128xf32>
    %29 = vector.extract_strided_slice %17 {offsets = [0, 128], sizes = [8, 128], strides = [1, 1]} : vector<8x384xf32> to vector<8x128xf32>
    %30 = vector.extract_strided_slice %20 {offsets = [0, 128], sizes = [8, 128], strides = [1, 1]} : vector<8x384xf32> to vector<8x128xf32>
    %31 = arith.addf %29, %30 : vector<8x128xf32>
    %32 = arith.negf %31 : vector<8x128xf32>
    %33 = math.exp %32 : vector<8x128xf32>
    %cst_16 = arith.constant 1.000000e+00 : f32
    %34 = vector.broadcast %cst_16 : f32 to vector<8x128xf32>
    %35 = arith.addf %34, %33 : vector<8x128xf32>
    %36 = arith.divf %34, %35 : vector<8x128xf32>
    %37 = vector.extract_strided_slice %17 {offsets = [0, 256], sizes = [8, 128], strides = [1, 1]} : vector<8x384xf32> to vector<8x128xf32>
    %38 = vector.extract_strided_slice %20 {offsets = [0, 256], sizes = [8, 128], strides = [1, 1]} : vector<8x384xf32> to vector<8x128xf32>
    %39 = arith.mulf %28, %38 : vector<8x128xf32>
    %40 = arith.addf %37, %39 : vector<8x128xf32>
    %41 = math.tanh %40 : vector<8x128xf32>
    %cst_17 = arith.constant 1.000000e+00 : f32
    %42 = vector.broadcast %cst_17 : f32 to vector<8x128xf32>
    %43 = arith.subf %42, %36 : vector<8x128xf32>
    %44 = arith.mulf %43, %41 : vector<8x128xf32>
    %45 = arith.mulf %36, %15 : vector<8x128xf32>
    %46 = arith.addf %44, %45 : vector<8x128xf32>
    %47 = arith.addf %16, %46 : vector<8x128xf32>
    %48 = vector.extract_strided_slice %12 {offsets = [8, 0], sizes = [8, 384], strides = [1, 1]} : vector<64x384xf32> to vector<8x384xf32>
    %cst_18 = arith.constant dense<0.000000e+00> : vector<8x384xf32>
    %49 = tpu.matmul %46, %13, %cst_18 {dimension_numbers = #tpu.dot_dimension_numbers<[1], [0], [0], [1], [0, 0, 1, 1], [], []>} : vector<8x128xf32>, vector<128x384xf32>, vector<8x384xf32> -> vector<8x384xf32>
    %50 = vector.broadcast %14 : vector<1x384xf32> to vector<8x384xf32>
    %51 = arith.addf %49, %50 : vector<8x384xf32>
    %52 = vector.extract_strided_slice %48 {offsets = [0, 0], sizes = [8, 128], strides = [1, 1]} : vector<8x384xf32> to vector<8x128xf32>
    %53 = vector.extract_strided_slice %51 {offsets = [0, 0], sizes = [8, 128], strides = [1, 1]} : vector<8x384xf32> to vector<8x128xf32>
    %54 = arith.addf %52, %53 : vector<8x128xf32>
    %55 = arith.negf %54 : vector<8x128xf32>
    %56 = math.exp %55 : vector<8x128xf32>
    %cst_19 = arith.constant 1.000000e+00 : f32
    %57 = vector.broadcast %cst_19 : f32 to vector<8x128xf32>
    %58 = arith.addf %57, %56 : vector<8x128xf32>
    %59 = arith.divf %57, %58 : vector<8x128xf32>
    %60 = vector.extract_strided_slice %48 {offsets = [0, 128], sizes = [8, 128], strides = [1, 1]} : vector<8x384xf32> to vector<8x128xf32>
    %61 = vector.extract_strided_slice %51 {offsets = [0, 128], sizes = [8, 128], strides = [1, 1]} : vector<8x384xf32> to vector<8x128xf32>
    %62 = arith.addf %60, %61 : vector<8x128xf32>
    %63 = arith.negf %62 : vector<8x128xf32>
    %64 = math.exp %63 : vector<8x128xf32>
    %cst_20 = arith.constant 1.000000e+00 : f32
    %65 = vector.broadcast %cst_20 : f32 to vector<8x128xf32>
    %66 = arith.addf %65, %64 : vector<8x128xf32>
    %67 = arith.divf %65, %66 : vector<8x128xf32>
    %68 = vector.extract_strided_slice %48 {offsets = [0, 256], sizes = [8, 128], strides = [1, 1]} : vector<8x384xf32> to vector<8x128xf32>
    %69 = vector.extract_strided_slice %51 {offsets = [0, 256], sizes = [8, 128], strides = [1, 1]} : vector<8x384xf32> to vector<8x128xf32>
    %70 = arith.mulf %59, %69 : vector<8x128xf32>
    %71 = arith.addf %68, %70 : vector<8x128xf32>
    %72 = math.tanh %71 : vector<8x128xf32>
    %cst_21 = arith.constant 1.000000e+00 : f32
    %73 = vector.broadcast %cst_21 : f32 to vector<8x128xf32>
    %74 = arith.subf %73, %67 : vector<8x128xf32>
    %75 = arith.mulf %74, %72 : vector<8x128xf32>
    %76 = arith.mulf %67, %46 : vector<8x128xf32>
    %77 = arith.addf %75, %76 : vector<8x128xf32>
    %78 = arith.addf %47, %77 : vector<8x128xf32>
    %79 = vector.extract_strided_slice %12 {offsets = [16, 0], sizes = [8, 384], strides = [1, 1]} : vector<64x384xf32> to vector<8x384xf32>
    %cst_22 = arith.constant dense<0.000000e+00> : vector<8x384xf32>
    %80 = tpu.matmul %77, %13, %cst_22 {dimension_numbers = #tpu.dot_dimension_numbers<[1], [0], [0], [1], [0, 0, 1, 1], [], []>} : vector<8x128xf32>, vector<128x384xf32>, vector<8x384xf32> -> vector<8x384xf32>
    %81 = vector.broadcast %14 : vector<1x384xf32> to vector<8x384xf32>
    %82 = arith.addf %80, %81 : vector<8x384xf32>
    %83 = vector.extract_strided_slice %79 {offsets = [0, 0], sizes = [8, 128], strides = [1, 1]} : vector<8x384xf32> to vector<8x128xf32>
    %84 = vector.extract_strided_slice %82 {offsets = [0, 0], sizes = [8, 128], strides = [1, 1]} : vector<8x384xf32> to vector<8x128xf32>
    %85 = arith.addf %83, %84 : vector<8x128xf32>
    %86 = arith.negf %85 : vector<8x128xf32>
    %87 = math.exp %86 : vector<8x128xf32>
    %cst_23 = arith.constant 1.000000e+00 : f32
    %88 = vector.broadcast %cst_23 : f32 to vector<8x128xf32>
    %89 = arith.addf %88, %87 : vector<8x128xf32>
    %90 = arith.divf %88, %89 : vector<8x128xf32>
    %91 = vector.extract_strided_slice %79 {offsets = [0, 128], sizes = [8, 128], strides = [1, 1]} : vector<8x384xf32> to vector<8x128xf32>
    %92 = vector.extract_strided_slice %82 {offsets = [0, 128], sizes = [8, 128], strides = [1, 1]} : vector<8x384xf32> to vector<8x128xf32>
    %93 = arith.addf %91, %92 : vector<8x128xf32>
    %94 = arith.negf %93 : vector<8x128xf32>
    %95 = math.exp %94 : vector<8x128xf32>
    %cst_24 = arith.constant 1.000000e+00 : f32
    %96 = vector.broadcast %cst_24 : f32 to vector<8x128xf32>
    %97 = arith.addf %96, %95 : vector<8x128xf32>
    %98 = arith.divf %96, %97 : vector<8x128xf32>
    %99 = vector.extract_strided_slice %79 {offsets = [0, 256], sizes = [8, 128], strides = [1, 1]} : vector<8x384xf32> to vector<8x128xf32>
    %100 = vector.extract_strided_slice %82 {offsets = [0, 256], sizes = [8, 128], strides = [1, 1]} : vector<8x384xf32> to vector<8x128xf32>
    %101 = arith.mulf %90, %100 : vector<8x128xf32>
    %102 = arith.addf %99, %101 : vector<8x128xf32>
    %103 = math.tanh %102 : vector<8x128xf32>
    %cst_25 = arith.constant 1.000000e+00 : f32
    %104 = vector.broadcast %cst_25 : f32 to vector<8x128xf32>
    %105 = arith.subf %104, %98 : vector<8x128xf32>
    %106 = arith.mulf %105, %103 : vector<8x128xf32>
    %107 = arith.mulf %98, %77 : vector<8x128xf32>
    %108 = arith.addf %106, %107 : vector<8x128xf32>
    %109 = arith.addf %78, %108 : vector<8x128xf32>
    %110 = vector.extract_strided_slice %12 {offsets = [24, 0], sizes = [8, 384], strides = [1, 1]} : vector<64x384xf32> to vector<8x384xf32>
    %cst_26 = arith.constant dense<0.000000e+00> : vector<8x384xf32>
    %111 = tpu.matmul %108, %13, %cst_26 {dimension_numbers = #tpu.dot_dimension_numbers<[1], [0], [0], [1], [0, 0, 1, 1], [], []>} : vector<8x128xf32>, vector<128x384xf32>, vector<8x384xf32> -> vector<8x384xf32>
    %112 = vector.broadcast %14 : vector<1x384xf32> to vector<8x384xf32>
    %113 = arith.addf %111, %112 : vector<8x384xf32>
    %114 = vector.extract_strided_slice %110 {offsets = [0, 0], sizes = [8, 128], strides = [1, 1]} : vector<8x384xf32> to vector<8x128xf32>
    %115 = vector.extract_strided_slice %113 {offsets = [0, 0], sizes = [8, 128], strides = [1, 1]} : vector<8x384xf32> to vector<8x128xf32>
    %116 = arith.addf %114, %115 : vector<8x128xf32>
    %117 = arith.negf %116 : vector<8x128xf32>
    %118 = math.exp %117 : vector<8x128xf32>
    %cst_27 = arith.constant 1.000000e+00 : f32
    %119 = vector.broadcast %cst_27 : f32 to vector<8x128xf32>
    %120 = arith.addf %119, %118 : vector<8x128xf32>
    %121 = arith.divf %119, %120 : vector<8x128xf32>
    %122 = vector.extract_strided_slice %110 {offsets = [0, 128], sizes = [8, 128], strides = [1, 1]} : vector<8x384xf32> to vector<8x128xf32>
    %123 = vector.extract_strided_slice %113 {offsets = [0, 128], sizes = [8, 128], strides = [1, 1]} : vector<8x384xf32> to vector<8x128xf32>
    %124 = arith.addf %122, %123 : vector<8x128xf32>
    %125 = arith.negf %124 : vector<8x128xf32>
    %126 = math.exp %125 : vector<8x128xf32>
    %cst_28 = arith.constant 1.000000e+00 : f32
    %127 = vector.broadcast %cst_28 : f32 to vector<8x128xf32>
    %128 = arith.addf %127, %126 : vector<8x128xf32>
    %129 = arith.divf %127, %128 : vector<8x128xf32>
    %130 = vector.extract_strided_slice %110 {offsets = [0, 256], sizes = [8, 128], strides = [1, 1]} : vector<8x384xf32> to vector<8x128xf32>
    %131 = vector.extract_strided_slice %113 {offsets = [0, 256], sizes = [8, 128], strides = [1, 1]} : vector<8x384xf32> to vector<8x128xf32>
    %132 = arith.mulf %121, %131 : vector<8x128xf32>
    %133 = arith.addf %130, %132 : vector<8x128xf32>
    %134 = math.tanh %133 : vector<8x128xf32>
    %cst_29 = arith.constant 1.000000e+00 : f32
    %135 = vector.broadcast %cst_29 : f32 to vector<8x128xf32>
    %136 = arith.subf %135, %129 : vector<8x128xf32>
    %137 = arith.mulf %136, %134 : vector<8x128xf32>
    %138 = arith.mulf %129, %108 : vector<8x128xf32>
    %139 = arith.addf %137, %138 : vector<8x128xf32>
    %140 = arith.addf %109, %139 : vector<8x128xf32>
    %141 = vector.extract_strided_slice %12 {offsets = [32, 0], sizes = [8, 384], strides = [1, 1]} : vector<64x384xf32> to vector<8x384xf32>
    %cst_30 = arith.constant dense<0.000000e+00> : vector<8x384xf32>
    %142 = tpu.matmul %139, %13, %cst_30 {dimension_numbers = #tpu.dot_dimension_numbers<[1], [0], [0], [1], [0, 0, 1, 1], [], []>} : vector<8x128xf32>, vector<128x384xf32>, vector<8x384xf32> -> vector<8x384xf32>
    %143 = vector.broadcast %14 : vector<1x384xf32> to vector<8x384xf32>
    %144 = arith.addf %142, %143 : vector<8x384xf32>
    %145 = vector.extract_strided_slice %141 {offsets = [0, 0], sizes = [8, 128], strides = [1, 1]} : vector<8x384xf32> to vector<8x128xf32>
    %146 = vector.extract_strided_slice %144 {offsets = [0, 0], sizes = [8, 128], strides = [1, 1]} : vector<8x384xf32> to vector<8x128xf32>
    %147 = arith.addf %145, %146 : vector<8x128xf32>
    %148 = arith.negf %147 : vector<8x128xf32>
    %149 = math.exp %148 : vector<8x128xf32>
    %cst_31 = arith.constant 1.000000e+00 : f32
    %150 = vector.broadcast %cst_31 : f32 to vector<8x128xf32>
    %151 = arith.addf %150, %149 : vector<8x128xf32>
    %152 = arith.divf %150, %151 : vector<8x128xf32>
    %153 = vector.extract_strided_slice %141 {offsets = [0, 128], sizes = [8, 128], strides = [1, 1]} : vector<8x384xf32> to vector<8x128xf32>
    %154 = vector.extract_strided_slice %144 {offsets = [0, 128], sizes = [8, 128], strides = [1, 1]} : vector<8x384xf32> to vector<8x128xf32>
    %155 = arith.addf %153, %154 : vector<8x128xf32>
    %156 = arith.negf %155 : vector<8x128xf32>
    %157 = math.exp %156 : vector<8x128xf32>
    %cst_32 = arith.constant 1.000000e+00 : f32
    %158 = vector.broadcast %cst_32 : f32 to vector<8x128xf32>
    %159 = arith.addf %158, %157 : vector<8x128xf32>
    %160 = arith.divf %158, %159 : vector<8x128xf32>
    %161 = vector.extract_strided_slice %141 {offsets = [0, 256], sizes = [8, 128], strides = [1, 1]} : vector<8x384xf32> to vector<8x128xf32>
    %162 = vector.extract_strided_slice %144 {offsets = [0, 256], sizes = [8, 128], strides = [1, 1]} : vector<8x384xf32> to vector<8x128xf32>
    %163 = arith.mulf %152, %162 : vector<8x128xf32>
    %164 = arith.addf %161, %163 : vector<8x128xf32>
    %165 = math.tanh %164 : vector<8x128xf32>
    %cst_33 = arith.constant 1.000000e+00 : f32
    %166 = vector.broadcast %cst_33 : f32 to vector<8x128xf32>
    %167 = arith.subf %166, %160 : vector<8x128xf32>
    %168 = arith.mulf %167, %165 : vector<8x128xf32>
    %169 = arith.mulf %160, %139 : vector<8x128xf32>
    %170 = arith.addf %168, %169 : vector<8x128xf32>
    %171 = arith.addf %140, %170 : vector<8x128xf32>
    %172 = vector.extract_strided_slice %12 {offsets = [40, 0], sizes = [8, 384], strides = [1, 1]} : vector<64x384xf32> to vector<8x384xf32>
    %cst_34 = arith.constant dense<0.000000e+00> : vector<8x384xf32>
    %173 = tpu.matmul %170, %13, %cst_34 {dimension_numbers = #tpu.dot_dimension_numbers<[1], [0], [0], [1], [0, 0, 1, 1], [], []>} : vector<8x128xf32>, vector<128x384xf32>, vector<8x384xf32> -> vector<8x384xf32>
    %174 = vector.broadcast %14 : vector<1x384xf32> to vector<8x384xf32>
    %175 = arith.addf %173, %174 : vector<8x384xf32>
    %176 = vector.extract_strided_slice %172 {offsets = [0, 0], sizes = [8, 128], strides = [1, 1]} : vector<8x384xf32> to vector<8x128xf32>
    %177 = vector.extract_strided_slice %175 {offsets = [0, 0], sizes = [8, 128], strides = [1, 1]} : vector<8x384xf32> to vector<8x128xf32>
    %178 = arith.addf %176, %177 : vector<8x128xf32>
    %179 = arith.negf %178 : vector<8x128xf32>
    %180 = math.exp %179 : vector<8x128xf32>
    %cst_35 = arith.constant 1.000000e+00 : f32
    %181 = vector.broadcast %cst_35 : f32 to vector<8x128xf32>
    %182 = arith.addf %181, %180 : vector<8x128xf32>
    %183 = arith.divf %181, %182 : vector<8x128xf32>
    %184 = vector.extract_strided_slice %172 {offsets = [0, 128], sizes = [8, 128], strides = [1, 1]} : vector<8x384xf32> to vector<8x128xf32>
    %185 = vector.extract_strided_slice %175 {offsets = [0, 128], sizes = [8, 128], strides = [1, 1]} : vector<8x384xf32> to vector<8x128xf32>
    %186 = arith.addf %184, %185 : vector<8x128xf32>
    %187 = arith.negf %186 : vector<8x128xf32>
    %188 = math.exp %187 : vector<8x128xf32>
    %cst_36 = arith.constant 1.000000e+00 : f32
    %189 = vector.broadcast %cst_36 : f32 to vector<8x128xf32>
    %190 = arith.addf %189, %188 : vector<8x128xf32>
    %191 = arith.divf %189, %190 : vector<8x128xf32>
    %192 = vector.extract_strided_slice %172 {offsets = [0, 256], sizes = [8, 128], strides = [1, 1]} : vector<8x384xf32> to vector<8x128xf32>
    %193 = vector.extract_strided_slice %175 {offsets = [0, 256], sizes = [8, 128], strides = [1, 1]} : vector<8x384xf32> to vector<8x128xf32>
    %194 = arith.mulf %183, %193 : vector<8x128xf32>
    %195 = arith.addf %192, %194 : vector<8x128xf32>
    %196 = math.tanh %195 : vector<8x128xf32>
    %cst_37 = arith.constant 1.000000e+00 : f32
    %197 = vector.broadcast %cst_37 : f32 to vector<8x128xf32>
    %198 = arith.subf %197, %191 : vector<8x128xf32>
    %199 = arith.mulf %198, %196 : vector<8x128xf32>
    %200 = arith.mulf %191, %170 : vector<8x128xf32>
    %201 = arith.addf %199, %200 : vector<8x128xf32>
    %202 = arith.addf %171, %201 : vector<8x128xf32>
    %203 = vector.extract_strided_slice %12 {offsets = [48, 0], sizes = [8, 384], strides = [1, 1]} : vector<64x384xf32> to vector<8x384xf32>
    %cst_38 = arith.constant dense<0.000000e+00> : vector<8x384xf32>
    %204 = tpu.matmul %201, %13, %cst_38 {dimension_numbers = #tpu.dot_dimension_numbers<[1], [0], [0], [1], [0, 0, 1, 1], [], []>} : vector<8x128xf32>, vector<128x384xf32>, vector<8x384xf32> -> vector<8x384xf32>
    %205 = vector.broadcast %14 : vector<1x384xf32> to vector<8x384xf32>
    %206 = arith.addf %204, %205 : vector<8x384xf32>
    %207 = vector.extract_strided_slice %203 {offsets = [0, 0], sizes = [8, 128], strides = [1, 1]} : vector<8x384xf32> to vector<8x128xf32>
    %208 = vector.extract_strided_slice %206 {offsets = [0, 0], sizes = [8, 128], strides = [1, 1]} : vector<8x384xf32> to vector<8x128xf32>
    %209 = arith.addf %207, %208 : vector<8x128xf32>
    %210 = arith.negf %209 : vector<8x128xf32>
    %211 = math.exp %210 : vector<8x128xf32>
    %cst_39 = arith.constant 1.000000e+00 : f32
    %212 = vector.broadcast %cst_39 : f32 to vector<8x128xf32>
    %213 = arith.addf %212, %211 : vector<8x128xf32>
    %214 = arith.divf %212, %213 : vector<8x128xf32>
    %215 = vector.extract_strided_slice %203 {offsets = [0, 128], sizes = [8, 128], strides = [1, 1]} : vector<8x384xf32> to vector<8x128xf32>
    %216 = vector.extract_strided_slice %206 {offsets = [0, 128], sizes = [8, 128], strides = [1, 1]} : vector<8x384xf32> to vector<8x128xf32>
    %217 = arith.addf %215, %216 : vector<8x128xf32>
    %218 = arith.negf %217 : vector<8x128xf32>
    %219 = math.exp %218 : vector<8x128xf32>
    %cst_40 = arith.constant 1.000000e+00 : f32
    %220 = vector.broadcast %cst_40 : f32 to vector<8x128xf32>
    %221 = arith.addf %220, %219 : vector<8x128xf32>
    %222 = arith.divf %220, %221 : vector<8x128xf32>
    %223 = vector.extract_strided_slice %203 {offsets = [0, 256], sizes = [8, 128], strides = [1, 1]} : vector<8x384xf32> to vector<8x128xf32>
    %224 = vector.extract_strided_slice %206 {offsets = [0, 256], sizes = [8, 128], strides = [1, 1]} : vector<8x384xf32> to vector<8x128xf32>
    %225 = arith.mulf %214, %224 : vector<8x128xf32>
    %226 = arith.addf %223, %225 : vector<8x128xf32>
    %227 = math.tanh %226 : vector<8x128xf32>
    %cst_41 = arith.constant 1.000000e+00 : f32
    %228 = vector.broadcast %cst_41 : f32 to vector<8x128xf32>
    %229 = arith.subf %228, %222 : vector<8x128xf32>
    %230 = arith.mulf %229, %227 : vector<8x128xf32>
    %231 = arith.mulf %222, %201 : vector<8x128xf32>
    %232 = arith.addf %230, %231 : vector<8x128xf32>
    %233 = arith.addf %202, %232 : vector<8x128xf32>
    %234 = vector.extract_strided_slice %12 {offsets = [56, 0], sizes = [8, 384], strides = [1, 1]} : vector<64x384xf32> to vector<8x384xf32>
    %cst_42 = arith.constant dense<0.000000e+00> : vector<8x384xf32>
    %235 = tpu.matmul %232, %13, %cst_42 {dimension_numbers = #tpu.dot_dimension_numbers<[1], [0], [0], [1], [0, 0, 1, 1], [], []>} : vector<8x128xf32>, vector<128x384xf32>, vector<8x384xf32> -> vector<8x384xf32>
    %236 = vector.broadcast %14 : vector<1x384xf32> to vector<8x384xf32>
    %237 = arith.addf %235, %236 : vector<8x384xf32>
    %238 = vector.extract_strided_slice %234 {offsets = [0, 0], sizes = [8, 128], strides = [1, 1]} : vector<8x384xf32> to vector<8x128xf32>
    %239 = vector.extract_strided_slice %237 {offsets = [0, 0], sizes = [8, 128], strides = [1, 1]} : vector<8x384xf32> to vector<8x128xf32>
    %240 = arith.addf %238, %239 : vector<8x128xf32>
    %241 = arith.negf %240 : vector<8x128xf32>
    %242 = math.exp %241 : vector<8x128xf32>
    %cst_43 = arith.constant 1.000000e+00 : f32
    %243 = vector.broadcast %cst_43 : f32 to vector<8x128xf32>
    %244 = arith.addf %243, %242 : vector<8x128xf32>
    %245 = arith.divf %243, %244 : vector<8x128xf32>
    %246 = vector.extract_strided_slice %234 {offsets = [0, 128], sizes = [8, 128], strides = [1, 1]} : vector<8x384xf32> to vector<8x128xf32>
    %247 = vector.extract_strided_slice %237 {offsets = [0, 128], sizes = [8, 128], strides = [1, 1]} : vector<8x384xf32> to vector<8x128xf32>
    %248 = arith.addf %246, %247 : vector<8x128xf32>
    %249 = arith.negf %248 : vector<8x128xf32>
    %250 = math.exp %249 : vector<8x128xf32>
    %cst_44 = arith.constant 1.000000e+00 : f32
    %251 = vector.broadcast %cst_44 : f32 to vector<8x128xf32>
    %252 = arith.addf %251, %250 : vector<8x128xf32>
    %253 = arith.divf %251, %252 : vector<8x128xf32>
    %254 = vector.extract_strided_slice %234 {offsets = [0, 256], sizes = [8, 128], strides = [1, 1]} : vector<8x384xf32> to vector<8x128xf32>
    %255 = vector.extract_strided_slice %237 {offsets = [0, 256], sizes = [8, 128], strides = [1, 1]} : vector<8x384xf32> to vector<8x128xf32>
    %256 = arith.mulf %245, %255 : vector<8x128xf32>
    %257 = arith.addf %254, %256 : vector<8x128xf32>
    %258 = math.tanh %257 : vector<8x128xf32>
    %cst_45 = arith.constant 1.000000e+00 : f32
    %259 = vector.broadcast %cst_45 : f32 to vector<8x128xf32>
    %260 = arith.subf %259, %253 : vector<8x128xf32>
    %261 = arith.mulf %260, %258 : vector<8x128xf32>
    %262 = arith.mulf %253, %232 : vector<8x128xf32>
    %263 = arith.addf %261, %262 : vector<8x128xf32>
    %264 = arith.addf %233, %263 : vector<8x128xf32>
    %cst_46 = arith.constant 1.250000e-01 : f32
    %265 = vector.broadcast %cst_46 : f32 to vector<8x128xf32>
    %266 = arith.mulf %264, %265 : vector<8x128xf32>
    %c0_47 = arith.constant 0 : index
    %c0_48 = arith.constant 0 : index
    %267 = vector.load %arg6[%c0_47, %c0_48] : memref<128x128xf32, #tpu.memory_space<vmem>>, vector<128x128xf32>
    %cst_49 = arith.constant dense<0.000000e+00> : vector<8x128xf32>
    %268 = tpu.matmul %266, %267, %cst_49 {dimension_numbers = #tpu.dot_dimension_numbers<[1], [0], [0], [1], [0, 0, 1, 1], [], []>} : vector<8x128xf32>, vector<128x128xf32>, vector<8x128xf32> -> vector<8x128xf32>
    %c0_50 = arith.constant 0 : index
    %c0_51 = arith.constant 0 : index
    %269 = vector.load %arg7[%c0_50, %c0_51] : memref<1x128xf32, #tpu.memory_space<vmem>>, vector<1x128xf32>
    %270 = vector.broadcast %269 : vector<1x128xf32> to vector<8x128xf32>
    %271 = arith.addf %268, %270 : vector<8x128xf32>
    %c0_52 = arith.constant 0 : index
    %c0_53 = arith.constant 0 : index
    %272 = vector.load %arg8[%c0_52, %c0_53] : memref<8x128xf32, #tpu.memory_space<vmem>>, vector<8x128xf32>
    tpu.vector_store %arg8[%c0_52, %c0_53], %271 {strides = array<i32>} : memref<8x128xf32, #tpu.memory_space<vmem>>, vector<8x128xf32>,
    return
  }
}

</mosaic_0001>

<bundles_post_ra>
// kernel: tpu_custom_call.1
= control target key start
LH: loop header
LB: loop body
LE: loop exit
PB: predicated region body
PF: predicated region fallthrough
CT: control target
= control target key end

     0   :  { %13 = vsyncpa [#allocation3], 0  ;;  %s4802_s0 = inlined_call_operand.vmem [shape: s32[64,1], index: 0, kind: input, shape index: {}]   ;;  %s4803_s1 = inlined_call_operand.hbm [shape: f32[50,300], index: 1, kind: input, shape index: {}]   ;;  %s4804_s2 = inlined_call_operand.hbm [shape: f32[300,384], index: 2, kind: input, shape index: {}]   ;;  %s4805_s3 = inlined_call_operand.hbm [shape: f32[128,384], index: 3, kind: input, shape index: {}]   ;;  %s4806_s4 = inlined_call_operand.vmem [shape: f32[1,384], index: 4, kind: input, shape index: {}]   ;;  %s4807_s5 = inlined_call_operand.vmem [shape: f32[1,384], index: 5, kind: input, shape index: {}]   ;;  %s4808_s6 = inlined_call_operand.hbm [shape: f32[128,128], index: 6, kind: input, shape index: {}]   ;;  %s4809_s7 = inlined_call_operand.vmem [shape: f32[1,128], index: 7, kind: input, shape index: {}]   ;;  %s4810_s8 = inlined_call_operand.hbm [shape: f32[8,128], index: 8, kind: output, shape index: {}]  }
   0x1   :  { %14 = vsyncpa [#allocation6], 0 }
   0x2   :  { %15 = vsyncpa [#allocation9], 0 }
   0x3   :  { %16 = vsyncpa [#allocation4], 0  ;;  %s4064_s27 = smov [#allocation5]   ;;  %s4065_s29 = smov [#allocation2]  }
   0x4   :  { %s36_s28 = sshll.u32 %s4064_s27, 4  ;;  %s24_s30 = sshll.u32 %s4065_s29, 4  ;;  %s37_s28 = int_to_ptr.vmem [resolvable:$true] %s36_s28  ;;  %s4123_s30 = int_to_ptr.vmem [resolvable:$true] %s24_s30 }
   0x5   :  { %s3946_s11 = scalar_lea.hbm %s4804_s2, 14592 }
   0x6   :  { %p3947_p0 = scmp.ne.s32.totalorder %s4804_s2, %s3946_s11  ;;  %p3950_p1 = scmp.lt.u32.totalorder %s3946_s11, %s4804_s2 }
   0x8   :  { %p3952_p2 = pnand %p3950_p1, %p3947_p0 }
   0xa   :  { %3955 = shalt.err (!%p3952_p2)
}
   0xb   :  { %s3956_s16 = scalar_lea.vmem %s37_s28, 14592  ;;  %p3961_p4 = scmp.lt.s32.totalorder %s37_s28, %s37_s28 }
   0xc   :  { %p3957_p3 = scmp.ne.s32.totalorder %s37_s28, %s3956_s16  ;;  %p3962_p5 = scmp.lt.s32.totalorder %s3956_s16, %s3956_s16 }
   0xe   :  { %p3963_p6 = por %p3962_p5, %p3961_p4 }
  0x10   :  { %p3964_p7 = pnand %p3963_p6, %p3957_p3 }
  0x12   :  { %3967 = shalt.err (!%p3964_p7)
}
  0x13   :  { %s4066_s17 = smov 384   ;;  %s4067_s18 = smov 24  }
  0x14   :  { %42 = dma.hbm_to_vmem [thread:$0]  %s4804_s2, 14592, %s37_s28, [#allocation6], %s4066_s17, %s4066_s17, %s4067_s18  }
  0x15   :  { %s3968_s23 = scalar_lea.hbm %s4803_s1, 2688 }
  0x16   :  { %p3969_p8 = scmp.ne.s32.totalorder %s4803_s1, %s3968_s23  ;;  %p3972_p9 = scmp.lt.u32.totalorder %s3968_s23, %s4803_s1 }
  0x18   :  { %p3974_p10 = pnand %p3972_p9, %p3969_p8 }
  0x1a   :  { %3977 = shalt.err (!%p3974_p10)
}
  0x1b   :  { %s3978_s29 = scalar_lea.vmem %s4123_s30, 2688  ;;  %p3983_p12 = scmp.lt.s32.totalorder %s4123_s30, %s4123_s30 }
  0x1c   :  { %p3979_p11 = scmp.ne.s32.totalorder %s4123_s30, %s3978_s29  ;;  %p3984_p13 = scmp.lt.s32.totalorder %s3978_s29, %s3978_s29 }
  0x1e   :  { %p3985_p0 = por %p3984_p13, %p3983_p12 }
  0x20   :  { %p3986_p1 = pnand %p3985_p0, %p3979_p11 }
  0x22   :  { %3989 = shalt.err (!%p3986_p1)
}
  0x23   :  { %30 = dma.hbm_to_vmem [thread:$0]  %s4803_s1, 2688, %s4123_s30, [#allocation3], %s4066_s17, %s4066_s17, %s4067_s18  }
  0x24   :  { %s4068_s9 = smov [#allocation7]   ;;  %s4069_s11 = smov [#allocation8]  }
  0x25   :  { %s48_s10 = sshll.u32 %s4068_s9, 4  ;;  %s64_s12 = sshll.u32 %s4069_s11, 4  ;;  %s49_s10 = int_to_ptr.vmem [resolvable:$true] %s48_s10  ;;  %s4160_s12 = int_to_ptr.vmem [resolvable:$true] %s64_s12 }
  0x26   :  { %s3990_s15 = scalar_lea.hbm %s4805_s3, 6144 }
  0x27   :  { %p3991_p2 = scmp.ne.s32.totalorder %s4805_s3, %s3990_s15  ;;  %p3994_p3 = scmp.lt.u32.totalorder %s3990_s15, %s4805_s3 }
  0x29   :  { %p3996_p4 = pnand %p3994_p3, %p3991_p2 }
  0x2b   :  { %3999 = shalt.err (!%p3996_p4)
}
  0x2c   :  { %s4000_s1 = scalar_lea.vmem %s49_s10, 6144  ;;  %p4005_p6 = scmp.lt.s32.totalorder %s49_s10, %s49_s10 }
  0x2d   :  { %p4001_p5 = scmp.ne.s32.totalorder %s49_s10, %s4000_s1  ;;  %p4006_p7 = scmp.lt.s32.totalorder %s4000_s1, %s4000_s1 }
  0x2f   :  { %p4007_p8 = por %p4006_p7, %p4005_p6 }
  0x31   :  { %p4008_p9 = pnand %p4007_p8, %p4001_p5 }
  0x33   :  { %4011 = shalt.err (!%p4008_p9)
}
  0x34   :  { %54 = dma.hbm_to_vmem [thread:$0]  %s4805_s3, 6144, %s49_s10, [#allocation6], %s4066_s17, %s4066_s17, %s4067_s18  }
  0x35   :  { %s4012_s25 = scalar_lea.hbm %s4808_s6, 2048 }
  0x36   :  { %p4013_p10 = scmp.ne.s32.totalorder %s4808_s6, %s4012_s25  ;;  %p4016_p11 = scmp.lt.u32.totalorder %s4012_s25, %s4808_s6 }
  0x38   :  { %p4018_p12 = pnand %p4016_p11, %p4013_p10 }
  0x3a   :  { %4021 = shalt.err (!%p4018_p12)
}
  0x3b   :  { %s4022_s28 = scalar_lea.vmem %s4160_s12, 2048  ;;  %p4027_p0 = scmp.lt.s32.totalorder %s4160_s12, %s4160_s12 }
  0x3c   :  { %p4023_p13 = scmp.ne.s32.totalorder %s4160_s12, %s4022_s28  ;;  %p4028_p1 = scmp.lt.s32.totalorder %s4022_s28, %s4022_s28 }
  0x3e   :  { %p4029_p2 = por %p4028_p1, %p4027_p0 }
  0x40   :  { %p4030_p3 = pnand %p4029_p2, %p4023_p13 }
  0x42   :  { %4033 = shalt.err (!%p4030_p3)
}
  0x43   :  { %s4070_s3 = smov 128   ;;  %s4071_s17 = smov 8  }
  0x44   :  { %70 = dma.hbm_to_vmem [thread:$0]  %s4808_s6, 2048, %s4160_s12, [#allocation9], %s4070_s3, %s4070_s3, %s4071_s17  }
  0x45   :  { %4056 = dma.done.wait [#allocation3], 2688  }
  0x46   :  { %4057 = vsyncadd [#allocation3], 4294964608 }
  0x47   :  { %4058 = dma.done.wait [#allocation6], 20736  }
  0x48   :  { %4059 = vsyncadd [#allocation6], 4294946560 }
  0x49   :  { %4060 = dma.done.wait [#allocation9], 2048  }
  0x4a   :  { %4061 = vsyncadd [#allocation9], 4294965248  ;;  %v4072_v0 = vmov 0   ;;  %v4073_v1 = vmov 0.0   ;;  %v89_v2 = vld [vmem:[%s4802_s0 + $0x10] sm:$0xff]  ;;  %v87_v3 = vld [vmem:[%s4802_s0] sm:$0xff]  ;;  %v85_v46 = vlaneseq }
  0x4b   :  { %3865 = vset.pattern.permute.xlu1 %v4072_v0  ;;  %3864 = vset.pattern.permute.xlu0 %v4072_v0  ;;  %v90_v4 = vld [vmem:[%s4802_s0 + $0x18] sm:$0xff]  ;;  %v88_v5 = vld [vmem:[%s4802_s0 + $0x8] sm:$0xff]  ;;  %v147_v7 = vld [vmem:[#allocation2 + $0x20] sm:$0xff]  ;;  %vm189_vm0 = vcmask 1041408   ;;  %vm164_vm1 = vcmask 408576   ;;  %vm573_vm10 = vcmask 1043456  }
  0x4c   :  { %263 = vmatprep.mubr.f32.mxu0 %v4073_v1  ;;  %102 = vperm.xlu1 %3865, %v89_v2   ;;  %v144_v6 = vld [vmem:[#allocation2 + $0x8] sm:$0xff]  ;;  %v143_v8 = vld [vmem:[#allocation2] sm:$0xff]  ;;  %v146_v9 = vld [vmem:[#allocation2 + $0x18] sm:$0xff]  ;;  %v4220_v47 = vand.u32 127, %v85_v46  ;;  %vm4074_vm11 = vmmov 1   ;;  %vm548_vm13 = vcmask 359424  }
  0x4d   :  { %96 = vperm.xlu0 %3864, %v87_v3   ;;  %v92_v10 = vld [vmem:[%s4802_s0 + $0x28] sm:$0xff]  ;;  %v91_v11 = vld [vmem:[%s4802_s0 + $0x20] sm:$0xff]  ;;  %v3166_v12 = vpack.c.bf16 %v147_v7, %v144_v6  ;;  %v3168_v13 = vpack.c.bf16 %v146_v9, %v143_v8  ;;  %v150_v14 = vld [vmem:[#allocation2 + $0x38] sm:$0xff]  ;;  %vm4076_vm14 = vmmov 0   ;;  %s4077_s29 = smov [#allocation10]  }
  0x4e   :  { %v153_v15 = vld [vmem:[#allocation2 + $0x50] sm:$0xff]  ;;  %v148_v18 = vld [vmem:[#allocation2 + $0x28] sm:$0xff]  ;;  %v159_v23 = vld [vmem:[#allocation2 + $0x80] sm:$0xff]  ;;  %s2489_s2 = sshll.u32 %s4077_s29, 4  ;;  %s2490_s2 = int_to_ptr.vmem [resolvable:$true] %s2489_s2 }
  0x4f   :  { %v145_v16 = vld [vmem:[#allocation2 + $0x10] sm:$0xff]  ;;  %v3170_v17 = vpack.c.bf16 %v153_v15, %v150_v14  ;;  %v152_v20 = vld [vmem:[#allocation2 + $0x48] sm:$0xff]  ;;  %3167 = vmatprep.subr.bf16.mxu0 %v3166_v12  ;;  %v151_v24 = vld [vmem:[#allocation2 + $0x40] sm:$0xff]  ;;  %s4034_s28 = scalar_lea.vmem %s2490_s2, 128  ;;  %p4039_p5 = scmp.lt.s32.totalorder %s2490_s2, %s2490_s2 }
  0x50   :  { %105 = vperm.xlu1 %3865, %v90_v4   ;;  %v149_v19 = vld [vmem:[#allocation2 + $0x30] sm:$0xff]  ;;  %v3178_v21 = vpack.c.bf16 %v148_v18, %v145_v16  ;;  %v156_v22 = vld [vmem:[#allocation2 + $0x68] sm:$0xff]  ;;  %3169 = vmatpush1.bf16.msra.mxu0 %v3168_v13  ;;  %v154_v26 = vld [vmem:[#allocation2 + $0x58] sm:$0xff]  ;;  %p4035_p4 = scmp.ne.s32.totalorder %s2490_s2, %s4034_s28  ;;  %p4040_p6 = scmp.lt.s32.totalorder %s4034_s28, %s4034_s28 }
  0x51   :  { %99 = vperm.xlu0 %3864, %v88_v5   ;;  %v3172_v25 = vpack.c.bf16 %v152_v20, %v149_v19  ;;  %v155_v27 = vld [vmem:[#allocation2 + $0x60] sm:$0xff]  ;;  %3171 = vmatprep.subr.bf16.mxu0 %v3170_v17  ;;  %v3174_v28 = vpack.c.bf16 %v159_v23, %v156_v22  ;;  %v3182_v29 = vpack.c.bf16 %v154_v26, %v151_v24  ;;  %v158_v30 = vld [vmem:[#allocation2 + $0x78] sm:$0xff]  ;;  %v157_v31 = vld [vmem:[#allocation2 + $0x70] sm:$0xff] }
  0x52   :  { %3179 = vmatprep.subr.bf16.mxu1 %v3178_v21  ;;  %v160_v32 = vld [vmem:[#allocation2 + $0x88] sm:$0xff]  ;;  %v94_v33 = vld [vmem:[%s4802_s0 + $0x38] sm:$0xff]  ;;  %v93_v34 = vld [vmem:[%s4802_s0 + $0x30] sm:$0xff]  ;;  %v3176_v35 = vpack.c.bf16 %v158_v30, %v155_v27  ;;  %p4041_p7 = por %p4040_p6, %p4039_p5 }
  0x53   :  { %3181 = vmatpush3.bf16.msra.mxu1 %v3178_v21  ;;  %v3186_v36 = vpack.c.bf16 %v160_v32, %v157_v31  ;;  %v162_v37 = vld [vmem:[#allocation2 + $0x98] sm:$0x3]  ;;  %v161_v38 = vld [vmem:[#allocation2 + $0x90] sm:$0x3]  ;;  %v163_v39 = vld [vmem:[#allocation2 + $0xa0] sm:$0x3] }
  0x54   :  { %111 = vperm.xlu1 %3865, %v92_v10   ;;  %3173 = vmatpush1.bf16.msra.mxu0 %v3172_v25  ;;  %v418_v40 = vld [vmem:[#allocation5 + $0x8] sm:$0xff]  ;;  %v421_v41 = vld [vmem:[#allocation5 + $0x20] sm:$0xff]  ;;  %v467_v43 = vld [vmem:[#allocation5 + $0x190] sm:$0xff]  ;;  %p4042_p8 = pnand %p4041_p7, %p4035_p4 }
  0x55   :  { %108 = vperm.xlu0 %3864, %v91_v11   ;;  %3183 = vmatprep.subr.bf16.mxu1 %v3182_v29  ;;  %v3190_v42 = vpack.c.bf16 %v421_v41, %v418_v40  ;;  %v470_v44 = vld [vmem:[#allocation5 + $0x1a8] sm:$0xff]  ;;  %v417_v48 = vld [vmem:[#allocation5] sm:$0xff]  ;;  %v420_v49 = vld [vmem:[#allocation5 + $0x18] sm:$0xff] }
  0x56   :  { %3175 = vmatprep.subr.bf16.mxu0 %v3174_v28  ;;  %v3268_v45 = vpack.c.bf16 %v470_v44, %v467_v43  ;;  %v424_v50 = vld [vmem:[#allocation5 + $0x38] sm:$0xff]  ;;  %v427_v51 = vld [vmem:[#allocation5 + $0x50] sm:$0xff]  ;;  %v3192_v54 = vpack.c.bf16 %v420_v49, %v417_v48  ;;  %v426_v57 = vld [vmem:[#allocation5 + $0x48] sm:$0xff] }
  0x57   :  { %3185 = vmatpush3.bf16.msra.mxu1 %v3182_v29  ;;  %v3194_v55 = vpack.c.bf16 %v427_v51, %v424_v50  ;;  %v423_v56 = vld [vmem:[#allocation5 + $0x30] sm:$0xff]  ;;  %v430_v59 = vld [vmem:[#allocation5 + $0x68] sm:$0xff]  ;;  %v433_v62 = vld [vmem:[#allocation5 + $0x80] sm:$0xff] }
  0x58   :  { %117 = vperm.xlu1 %3865, %v94_v33   ;;  %3177 = vmatpush1.bf16.msra.mxu0 %v3176_v35  ;;  %v419_v60 = vld [vmem:[#allocation5 + $0x10] sm:$0xff]  ;;  %v422_v61 = vld [vmem:[#allocation5 + $0x28] sm:$0xff]  ;;  %v473_v63 = vld [vmem:[#allocation5 + $0x1c0] sm:$0xff]  ;;  %v3196_v4 = vpack.c.bf16 %v426_v57, %v423_v56  ;;  %v3198_v10 = vpack.c.bf16 %v433_v62, %v430_v59 }
  0x59   :  { %114 = vperm.xlu0 %3864, %v93_v34   ;;  %3187 = vmatprep.subr.bf16.mxu1 %v3186_v36  ;;  %v476_v0 = vld [vmem:[#allocation5 + $0x1d8] sm:$0xff]  ;;  %v429_v6 = vld [vmem:[#allocation5 + $0x60] sm:$0xff]  ;;  %v3270_v8 = vpack.c.bf16 %v422_v61, %v419_v60  ;;  %v439_v15 = vld [vmem:[#allocation5 + $0xb0] sm:$0xff] }
  0x5a   :  { %2508 = vmatprep.subr.msk.mxu0 %vm189_vm0, %v162_v37  ;;  %v432_v7 = vld [vmem:[#allocation5 + $0x78] sm:$0xff]  ;;  %v3272_v12 = vpack.c.bf16 %v476_v0, %v473_v63  ;;  %v425_v13 = vld [vmem:[#allocation5 + $0x40] sm:$0xff]  ;;  %v479_v16 = vld [vmem:[#allocation5 + $0x1f0] sm:$0xff] }
  0x5b   :  { %3189 = vmatpush3.bf16.msra.mxu1 %v3186_v36  ;;  %v436_v11 = vld [vmem:[#allocation5 + $0x98] sm:$0xff]  ;;  %v482_v17 = vld [vmem:[#allocation5 + $0x208] sm:$0xff]  ;;  %v3200_v21 = vpack.c.bf16 %v432_v7, %v429_v6  ;;  %v435_v22 = vld [vmem:[#allocation5 + $0x90] sm:$0xff] }
  0x5c   :  { %2509 = vmatpush1.msk.msra.mxu0 %vm189_vm0, %v161_v38  ;;  %2813 = vmatprep.subr.msk.mxu1 %vm189_vm0, %v163_v39  ;;  %v428_v14 = vld [vmem:[#allocation5 + $0x58] sm:$0xff]  ;;  %v438_v23 = vld [vmem:[#allocation5 + $0xa8] sm:$0xff]  ;;  %v3202_v26 = vpack.c.bf16 %v439_v15, %v436_v11  ;;  %v3276_v28 = vpack.c.bf16 %v482_v17, %v479_v16  ;;  %v431_v29 = vld [vmem:[#allocation5 + $0x70] sm:$0xff] }
  0x5d   :  { %3191 = vmatprep.subr.bf16.mxu0 %v3190_v42  ;;  %v3274_v24 = vpack.c.bf16 %v428_v14, %v425_v13  ;;  %v442_v27 = vld [vmem:[#allocation5 + $0xc8] sm:$0xff]  ;;  %v445_v31 = vld [vmem:[#allocation5 + $0xe0] sm:$0xff]  ;;  %v488_v33 = vld [vmem:[#allocation5 + $0x238] sm:$0xff]  ;;  %v3204_v36 = vpack.c.bf16 %v438_v23, %v435_v22 }
  0x5e   :  { %v434_v30 = vld [vmem:[#allocation5 + $0x88] sm:$0xff]  ;;  %v485_v32 = vld [vmem:[#allocation5 + $0x220] sm:$0xff]  ;;  %v444_v38 = vld [vmem:[#allocation5 + $0xd8] sm:$0xff]  ;;  %v3206_v42 = vpack.c.bf16 %v445_v31, %v442_v27 }
  0x5f   :  { %2814 = vmatpush3.msk.msra.mxu1 %vm189_vm0, %v163_v39  ;;  %v441_v37 = vld [vmem:[#allocation5 + $0xc0] sm:$0xff]  ;;  %v3278_v39 = vpack.c.bf16 %v434_v30, %v431_v29  ;;  %v448_v43 = vld [vmem:[#allocation5 + $0xf8] sm:$0xff]  ;;  %v3280_v44 = vpack.c.bf16 %v488_v33, %v485_v32  ;;  %v451_v49 = vld [vmem:[#allocation5 + $0x110] sm:$0xff] }
  0x60   :  { %3269 = vmatprep.subr.bf16.mxu1 %v3268_v45  ;;  %v437_v45 = vld [vmem:[#allocation5 + $0xa0] sm:$0xff]  ;;  %v440_v48 = vld [vmem:[#allocation5 + $0xb8] sm:$0xff]  ;;  %v491_v50 = vld [vmem:[#allocation5 + $0x250] sm:$0xff]  ;;  %v3210_v56 = vpack.c.bf16 %v451_v49, %v448_v43 }
  0x61   :  { %v494_v51 = vld [vmem:[#allocation5 + $0x268] sm:$0xff]  ;;  %v443_v59 = vld [vmem:[#allocation5 + $0xd0] sm:$0xff]  ;;  %v457_v61 = vld [vmem:[#allocation5 + $0x140] sm:$0xff] }
  0x62   :  { %v454_v57 = vld [vmem:[#allocation5 + $0x128] sm:$0xff]  ;;  %v497_v62 = vld [vmem:[#allocation5 + $0x280] sm:$0xff]  ;;  %v500_v63 = vld [vmem:[#allocation5 + $0x298] sm:$0xff] }
  0x63   :  { %v446_v60 = vld [vmem:[#allocation5 + $0xe8] sm:$0xff]  ;;  %v460_v6 = vld [vmem:[#allocation5 + $0x158] sm:$0xff]  ;;  %v3288_v7 = vpack.c.bf16 %v500_v63, %v497_v62  ;;  %v503_v11 = vld [vmem:[#allocation5 + $0x2b0] sm:$0xff] }
  0x64   :  { %v459_v14 = vld [vmem:[#allocation5 + $0x150] sm:$0xff]  ;;  %v462_v15 = vld [vmem:[#allocation5 + $0x168] sm:$0xff]  ;;  %v469_v22 = vld [vmem:[#allocation5 + $0x1a0] sm:$0xff] }
  0x65   :  { %v509_v23 = vld [vmem:[#allocation5 + $0x2e0] sm:$0xff]  ;;  %v468_v29 = vld [vmem:[#allocation5 + $0x198] sm:$0xff]  ;;  %v475_v32 = vld [vmem:[#allocation5 + $0x1d0] sm:$0xff] }
  0x66   :  { %v472_v31 = vld [vmem:[#allocation5 + $0x1b8] sm:$0xff]  ;;  %v483_v49 = vld [vmem:[#allocation5 + $0x210] sm:$0xff]  ;;  %v502_v62 = vld [vmem:[#allocation5 + $0x2a8] sm:$0xff] }
  0x67   :  { %v484_v43 = vld [vmem:[#allocation5 + $0x218] sm:$0xff]  ;;  %v505_v63 = vld [vmem:[#allocation5 + $0x2c0] sm:$0xff]  ;;  %vm4274_vm12 = vmpackc.low %vm573_vm10, %vm4074_vm11 }
  0xcb   :  { %v103_v52 = vpop.permute.xlu1 %102 }
  0xcc   :  { %v97_v53 = vpop.permute.xlu0 %96  ;;  %vm121_vm3 = vcmp.eq.s32.totalorder %v4220_v47, %v103_v52  ;;  %v3208_v52 = vpack.c.bf16 %v444_v38, %v441_v37  ;;  %v478_v37 = vld [vmem:[#allocation5 + $0x1e8] sm:$0xff]  ;;  %v481_v38 = vld [vmem:[#allocation5 + $0x200] sm:$0xff] }
  0xcd   :  { %vm119_vm2 = vcmp.eq.s32.totalorder %v4220_v47, %v97_v53  ;;  %v2502_v5 = vsel %vm121_vm3, 1.0, %v4073_v1  ;;  %v447_v53 = vld [vmem:[#allocation5 + $0xf0] sm:$0xff] }
  0xce   :  { %v2500_v58 = vsel %vm119_vm2, 1.0, %v4073_v1 }
  0xcf   :  { %2510 = vmatmul.mubr.msk.f32.vlgmr.msra.gmra.mrb[0].mxu0 %vm164_vm1, %v2500_v58  ;;  %2815 = vmatprep.mubr.msk.f32.mxu1 %vm164_vm1, %v2500_v58  ;;  %v106_v2 = vpop.permute.xlu1 %105  ;;  %v3284_v58 = vpack.c.bf16 %v494_v51, %v491_v50  ;;  %v486_v50 = vld [vmem:[#allocation5 + $0x228] sm:$0xff] }
  0xd0   :  { %v100_v3 = vpop.permute.xlu0 %99  ;;  %269 = vmatprep.mubr.f32.mxu0 %v4073_v1  ;;  %3193 = vmatpush1.bf16.msra.mxu0 %v3192_v54  ;;  %vm122_vm4 = vcmp.eq.s32.totalorder %v4220_v47, %v106_v2  ;;  %v450_v54 = vld [vmem:[#allocation5 + $0x108] sm:$0xff]  ;;  %v453_v2 = vld [vmem:[#allocation5 + $0x120] sm:$0xff] }
  0xd1   :  { %vm120_vm5 = vcmp.eq.s32.totalorder %v4220_v47, %v100_v3  ;;  %3195 = vmatprep.subr.bf16.mxu0 %v3194_v55  ;;  %v2503_v18 = vsel %vm122_vm4, 1.0, %v4073_v1  ;;  %v3282_v55 = vpack.c.bf16 %v440_v48, %v437_v45  ;;  %v3212_v0 = vpack.c.bf16 %v450_v54, %v447_v53  ;;  %v456_v3 = vld [vmem:[#allocation5 + $0x138] sm:$0xff]  ;;  %v490_v51 = vld [vmem:[#allocation5 + $0x248] sm:$0xff] }
  0xd2   :  { %v2501_v9 = vsel %vm120_vm5, 1.0, %v4073_v1  ;;  %v3216_v13 = vpack.c.bf16 %v456_v3, %v453_v2  ;;  %v3236_v53 = vpack.c.bf16 %v486_v50, %v483_v49  ;;  %v3246_v2 = vpack.c.bf16 %v505_v63, %v502_v62  ;;  %v501_v3 = vld [vmem:[#allocation5 + $0x2a0] sm:$0xff]  ;;  %v1020_v50 = vld [vmem:[#allocation7 + $0x8] sm:$0xff]  ;;  %v1042_v49 = vld [vmem:[#allocation7 + $0xb8] sm:$0xff] }
  0xd3   :  { %2511 = vmatmul.mubr.msk.f32.gmra.mrb[2].mxu0 %vm164_vm1, %v2501_v9  ;;  %2816 = vmatmul.mubr.msk.f32.vlgmr.msra.gmra.mrb[0].mxu1 %vm164_vm1, %v2501_v9  ;;  %v112_v19 = vpop.permute.xlu1 %111  ;;  %v452_v9 = vld [vmem:[#allocation5 + $0x118] sm:$0xff] }
  0xd4   :  { %v109_v20 = vpop.permute.xlu0 %108  ;;  %275 = vmatprep.mubr.f32.mxu0 %v4073_v1  ;;  %2818 = vmatprep.mubr.msk.f32.mxu1 %vm164_vm1, %v2502_v5  ;;  %vm124_vm7 = vcmp.eq.s32.totalorder %v4220_v47, %v112_v19 }
  0xd5   :  { %vm123_vm6 = vcmp.eq.s32.totalorder %v4220_v47, %v109_v20  ;;  %3197 = vmatpush1.bf16.msra.mxu0 %v3196_v4  ;;  %3271 = vmatpush3.bf16.msra.mxu1 %v3270_v8  ;;  %v2505_v40 = vsel %vm124_vm7, 1.0, %v4073_v1  ;;  %v3286_v4 = vpack.c.bf16 %v446_v60, %v443_v59  ;;  %v449_v8 = vld [vmem:[#allocation5 + $0x100] sm:$0xff]  ;;  %v455_v20 = vld [vmem:[#allocation5 + $0x130] sm:$0xff] }
  0xd6   :  { %v2504_v25 = vsel %vm123_vm6, 1.0, %v4073_v1  ;;  %3199 = vmatprep.subr.bf16.mxu0 %v3198_v10  ;;  %3273 = vmatprep.subr.bf16.mxu1 %v3272_v12  ;;  %v463_v10 = vld [vmem:[#allocation5 + $0x170] sm:$0xff]  ;;  %v506_v12 = vld [vmem:[#allocation5 + $0x2c8] sm:$0xff]  ;;  %v3290_v16 = vpack.c.bf16 %v452_v9, %v449_v8 }
  0xd7   :  { %2512 = vmatmul.mubr.msk.f32.gmra.mrb[4].mxu0 %vm164_vm1, %v2502_v5  ;;  %2819 = vmatmul.mubr.msk.f32.gmra.mrb[2].mxu1 %vm164_vm1, %v2503_v18  ;;  %v118_v34 = vpop.permute.xlu1 %117  ;;  %v3214_v5 = vpack.c.bf16 %v457_v61, %v454_v57  ;;  %v3218_v17 = vpack.c.bf16 %v463_v10, %v460_v6  ;;  %v3292_v19 = vpack.c.bf16 %v506_v12, %v503_v11  ;;  %v499_v57 = vld [vmem:[#allocation5 + $0x290] sm:$0xff]  ;;  %v498_v61 = vld [vmem:[#allocation5 + $0x288] sm:$0xff]  ;;  %v461_v12 = vld [vmem:[#allocation5 + $0x160] sm:$0xff] }
  0xd8   :  { %2821 = vmatprep.mubr.msk.f32.mxu1 %vm164_vm1, %v2504_v25  ;;  %v115_v35 = vpop.permute.xlu0 %114  ;;  %281 = vmatprep.mubr.f32.mxu0 %v4073_v1  ;;  %vm126_vm9 = vcmp.eq.s32.totalorder %v4220_v47, %v118_v34  ;;  %v3226_v34 = vpack.c.bf16 %v475_v32, %v472_v31  ;;  %v495_v60 = vld [vmem:[#allocation5 + $0x270] sm:$0xff]  ;;  %v510_v10 = vld [vmem:[#allocation5 + $0x2e8] sm:$0xff] }
  0xd9   :  { %vm125_vm8 = vcmp.eq.s32.totalorder %v4220_v47, %v115_v35  ;;  %3201 = vmatpush1.bf16.msra.mxu0 %v3200_v21  ;;  %3275 = vmatpush3.bf16.msra.mxu1 %v3274_v24  ;;  %v2507_v47 = vsel %vm126_vm9, 1.0, %v4073_v1  ;;  %v458_v21 = vld [vmem:[#allocation5 + $0x148] sm:$0xff]  ;;  %v512_v24 = vld [vmem:[#allocation5 + $0x2f8] sm:$0xff]  ;;  %v471_v35 = vld [vmem:[#allocation5 + $0x1b0] sm:$0xff] }
  0xda   :  { %v4251_v41 = vsel %vm125_vm8, 1.0, %v4073_v1  ;;  %3203 = vmatprep.subr.bf16.mxu0 %v3202_v26  ;;  %3277 = vmatprep.subr.bf16.mxu1 %v3276_v28  ;;  %v3294_v26 = vpack.c.bf16 %v458_v21, %v455_v20  ;;  %v465_v28 = vld [vmem:[#allocation5 + $0x180] sm:$0xff]  ;;  %v3296_v30 = vpack.c.bf16 %v512_v24, %v509_v23  ;;  %v511_v6 = vld [vmem:[#allocation5 + $0x2f0] sm:$0xff]  ;;  %v520_v23 = vld [vmem:[#allocation5 + $0x338] sm:$0xff] }
  0xdb   :  { %2513 = vmatmul.mubr.msk.f32.gmra.mrb[6].mxu0 %vm164_vm1, %v2503_v18  ;;  %2822 = vmatmul.mubr.msk.f32.gmra.mrb[4].mxu1 %vm164_vm1, %v2505_v40  ;;  %v466_v18 = vld [vmem:[#allocation5 + $0x188] sm:$0xff]  ;;  %v3224_v33 = vpack.c.bf16 %v468_v29, %v465_v28  ;;  %v507_v9 = vld [vmem:[#allocation5 + $0x2d0] sm:$0xff]  ;;  %v513_v21 = vld [vmem:[#allocation5 + $0x300] sm:$0xff] }
  0xdc   :  { %2824 = vmatprep.mubr.msk.f32.mxu1 %vm164_vm1, %v4251_v41  ;;  %287 = vmatprep.mubr.f32.mxu0 %v4073_v1  ;;  %v3222_v27 = vpack.c.bf16 %v469_v22, %v466_v18  ;;  %v3252_v11 = vpack.c.bf16 %v510_v10, %v507_v9  ;;  %v515_v18 = vld [vmem:[#allocation5 + $0x310] sm:$0xff]  ;;  %v516_v22 = vld [vmem:[#allocation5 + $0x318] sm:$0xff]  ;;  %v522_v32 = vld [vmem:[#allocation5 + $0x348] sm:$0xff] }
  0xdd   :  { %3205 = vmatpush1.bf16.msra.mxu0 %v3204_v36  ;;  %3279 = vmatpush3.bf16.msra.mxu1 %v3278_v39  ;;  %v474_v36 = vld [vmem:[#allocation5 + $0x1c8] sm:$0xff]  ;;  %v523_v24 = vld [vmem:[#allocation5 + $0x350] sm:$0xff]  ;;  %v3256_v28 = vpack.c.bf16 %v516_v22, %v513_v21 }
  0xde   :  { %3207 = vmatprep.subr.bf16.mxu0 %v3206_v42  ;;  %3281 = vmatprep.subr.bf16.mxu1 %v3280_v44  ;;  %v3228_v39 = vpack.c.bf16 %v474_v36, %v471_v35  ;;  %v480_v42 = vld [vmem:[#allocation5 + $0x1f8] sm:$0xff]  ;;  %v487_v44 = vld [vmem:[#allocation5 + $0x230] sm:$0xff]  ;;  %v529_v35 = vld [vmem:[#allocation5 + $0x380] sm:$0xf] }
  0xdf   :  { %2514 = vmatmul.mubr.msk.f32.gmra.mrb[8].mxu0 %vm164_vm1, %v2504_v25  ;;  %2825 = vmatmul.mubr.msk.f32.gmra.mrb[6].mxu1 %vm164_vm1, %v2507_v47  ;;  %v3220_v25 = vpack.c.bf16 %v462_v15, %v459_v14  ;;  %v3234_v48 = vpack.c.bf16 %v487_v44, %v484_v43  ;;  %v514_v15 = vld [vmem:[#allocation5 + $0x308] sm:$0xff]  ;;  %v519_v31 = vld [vmem:[#allocation5 + $0x330] sm:$0xff]  ;;  %v525_v44 = vld [vmem:[#allocation5 + $0x360] sm:$0xff] }
  0xe0   :  { %293 = vmatprep.mubr.f32.mxu0 %v4073_v1  ;;  %v527_v36 = vld [vmem:[#allocation5 + $0x370] sm:$0xff]  ;;  %v1022_v10 = vld [vmem:[#allocation7 + $0x18] sm:$0xff] }
  0xe1   :  { %3209 = vmatpush1.bf16.msra.mxu0 %v3208_v52  ;;  %3283 = vmatpush3.bf16.msra.mxu1 %v3282_v55  ;;  %v493_v52 = vld [vmem:[#allocation5 + $0x260] sm:$0xff]  ;;  %v1019_v9 = vld [vmem:[#allocation7] sm:$0xff] }
  0xe2   :  { %3211 = vmatprep.subr.bf16.mxu0 %v3210_v56  ;;  %3285 = vmatprep.subr.bf16.mxu1 %v3284_v58  ;;  %v3238_v54 = vpack.c.bf16 %v493_v52, %v490_v51  ;;  %v489_v55 = vld [vmem:[#allocation5 + $0x240] sm:$0xff]  ;;  %v496_v56 = vld [vmem:[#allocation5 + $0x278] sm:$0xff]  ;;  %v1023_v51 = vld [vmem:[#allocation7 + $0x20] sm:$0xff] }
  0xe3   :  { %2515 = vmatmul.mubr.msk.f32.gmra.mrb[10].mxu0 %vm164_vm1, %v2505_v40  ;;  %v3230_v40 = vpack.c.bf16 %v481_v38, %v478_v37  ;;  %v3242_v59 = vpack.c.bf16 %v499_v57, %v496_v56  ;;  %v530_v37 = vld [vmem:[#allocation5 + $0x388] sm:$0xf]  ;;  %v4286_v56 = vpack.c.bf16 %v1023_v51, %v1020_v50 }
  0xe4   :  { %299 = vmatprep.mubr.f32.mxu0 %v4073_v1 }
  0xe5   :  { %3213 = vmatpush1.bf16.msra.mxu0 %v3212_v0  ;;  %3287 = vmatpush3.bf16.msra.mxu1 %v3286_v4  ;;  %v3244_v0 = vpack.c.bf16 %v498_v61, %v495_v60  ;;  %v504_v4 = vld [vmem:[#allocation5 + $0x2b8] sm:$0xff]  ;;  %v4075_v61 = vmov 0.0|0.0  }
  0xe6   :  { %3215 = vmatprep.subr.bf16.mxu0 %v3214_v5  ;;  %3289 = vmatprep.subr.bf16.mxu1 %v3288_v7  ;;  %v508_v5 = vld [vmem:[#allocation5 + $0x2d8] sm:$0xff]  ;;  %v3248_v7 = vpack.c.bf16 %v504_v4, %v501_v3 }
  0xe7   :  { %2516 = vmatmul.mubr.msk.f32.gmra.mrb[12].mxu0 %vm164_vm1, %v4251_v41  ;;  %v477_v41 = vld [vmem:[#allocation5 + $0x1e0] sm:$0xff]  ;;  %v3250_v8 = vpack.c.bf16 %v511_v6, %v508_v5 }
  0xe8   :  { %305 = vmatprep.mubr.f32.mxu0 %v4073_v1  ;;  %v3232_v45 = vpack.c.bf16 %v480_v42, %v477_v41 }
  0xe9   :  { %3217 = vmatpush1.bf16.msra.mxu0 %v3216_v13  ;;  %3291 = vmatpush3.bf16.msra.mxu1 %v3290_v16  ;;  %v464_v13 = vld [vmem:[#allocation5 + $0x178] sm:$0xff]  ;;  %v517_v16 = vld [vmem:[#allocation5 + $0x320] sm:$0xff] }
  0xea   :  { %3219 = vmatprep.subr.bf16.mxu0 %v3218_v17  ;;  %3293 = vmatprep.subr.bf16.mxu1 %v3292_v19  ;;  %v3298_v14 = vpack.c.bf16 %v464_v13, %v461_v12  ;;  %v3254_v17 = vpack.c.bf16 %v517_v16, %v514_v15  ;;  %v518_v19 = vld [vmem:[#allocation5 + $0x328] sm:$0xff]  ;;  %v1029_v12 = vld [vmem:[#allocation7 + $0x50] sm:$0xff]  ;;  %v4305_v15 = vpack.c.bf16 %v1022_v10, %v1019_v9 }
  0xeb   :  { %2517 = vmatmul.mubr.msk.f32.gmra.mrb[14].mxu0 %vm164_vm1, %v2507_v47  ;;  %v492_v47 = vld [vmem:[#allocation5 + $0x258] sm:$0xff]  ;;  %v3300_v20 = vpack.c.bf16 %v518_v19, %v515_v18  ;;  %v1021_v13 = vld [vmem:[#allocation7 + $0x10] sm:$0xff] }
  0xec   :  { %v3240_v58 = vpack.c.bf16 %v492_v47, %v489_v55  ;;  %v1028_v18 = vld [vmem:[#allocation7 + $0x48] sm:$0xff] }
  0xed   :  { %3221 = vmatpush1.bf16.msra.mxu0 %v3220_v25  ;;  %3295 = vmatpush3.bf16.msra.mxu1 %v3294_v26  ;;  %v521_v25 = vld [vmem:[#allocation5 + $0x340] sm:$0xff]  ;;  %v524_v26 = vld [vmem:[#allocation5 + $0x358] sm:$0xff] }
  0xee   :  { %3223 = vmatprep.subr.bf16.mxu0 %v3222_v27  ;;  %3297 = vmatprep.subr.bf16.mxu1 %v3296_v30  ;;  %v3258_v30 = vpack.c.bf16 %v523_v24, %v520_v23  ;;  %v1032_v19 = vld [vmem:[#allocation7 + $0x68] sm:$0xff]  ;;  %v1031_v24 = vld [vmem:[#allocation7 + $0x60] sm:$0xff] }
  0xf1   :  { %3225 = vmatpush1.bf16.msra.mxu0 %v3224_v33  ;;  %3299 = vmatpush3.bf16.msra.mxu1 %v3298_v14  ;;  %v526_v33 = vld [vmem:[#allocation5 + $0x368] sm:$0xff]  ;;  %v1024_v14 = vld [vmem:[#allocation7 + $0x28] sm:$0xff] }
  0xf2   :  { %3227 = vmatprep.subr.bf16.mxu0 %v3226_v34  ;;  %3301 = vmatprep.subr.bf16.mxu1 %v3300_v20  ;;  %v3304_v34 = vpack.c.bf16 %v524_v26, %v521_v25  ;;  %v3262_v43 = vpack.c.bf16 %v529_v35, %v526_v33  ;;  %v4309_v21 = vpack.c.bf16 %v1024_v14, %v1021_v13  ;;  %v1034_v25 = vld [vmem:[#allocation7 + $0x78] sm:$0xff]  ;;  %v1040_v33 = vld [vmem:[#allocation7 + $0xa8] sm:$0xff]  ;;  %v1047_v35 = vld [vmem:[#allocation7 + $0xe0] sm:$0xff] }
  0xf3   :  { %v1038_v26 = vld [vmem:[#allocation7 + $0x98] sm:$0xff]  ;;  %v1060_v14 = vld [vmem:[#allocation7 + $0x148] sm:$0xff] }
  0xf5   :  { %3229 = vmatpush1.bf16.msra.mxu0 %v3228_v39 }
  0xf6   :  { %3231 = vmatprep.subr.bf16.mxu0 %v3230_v40  ;;  %v3260_v40 = vpack.c.bf16 %v522_v32, %v519_v31  ;;  %v1037_v32 = vld [vmem:[#allocation7 + $0x90] sm:$0xff] }
  0xf9   :  { %3233 = vmatpush1.bf16.msra.mxu0 %v3232_v45  ;;  %v528_v45 = vld [vmem:[#allocation5 + $0x378] sm:$0xf] }
  0xfa   :  { %3235 = vmatprep.subr.bf16.mxu0 %v3234_v48  ;;  %v3308_v48 = vpack.c.bf16 %v530_v37, %v527_v36  ;;  %v1033_v37 = vld [vmem:[#allocation7 + $0x70] sm:$0xff] }
  0xfd   :  { %3237 = vmatpush1.bf16.msra.mxu0 %v3236_v53 }
  0xfe   :  { %3239 = vmatprep.subr.bf16.mxu0 %v3238_v54  ;;  %v3265_v54 = vpack.c.bf16 %v528_v45, %v525_v44  ;;  %v1053_v44 = vld [vmem:[#allocation7 + $0x110] sm:$0xff] }
 0x101   :  { %3241 = vmatpush1.bf16.msra.mxu0 %v3240_v58 }
 0x102   :  { %3243 = vmatprep.subr.bf16.mxu0 %v3242_v59 }
 0x105   :  { %3245 = vmatpush1.bf16.msra.mxu0 %v3244_v0 }
 0x106   :  { %3247 = vmatprep.subr.bf16.mxu0 %v3246_v2 }
 0x109   :  { %3249 = vmatpush1.bf16.msra.mxu0 %v3248_v7 }
 0x10a   :  { %3251 = vmatprep.subr.bf16.mxu0 %v3250_v8 }
 0x10d   :  { %3253 = vmatpush1.bf16.msra.mxu0 %v3252_v11  ;;  %v1026_v11 = vld [vmem:[#allocation7 + $0x38] sm:$0xff] }
 0x10e   :  { %3255 = vmatprep.subr.bf16.mxu0 %v3254_v17  ;;  %v4307_v16 = vpack.c.bf16 %v1029_v12, %v1026_v11  ;;  %v1025_v17 = vld [vmem:[#allocation7 + $0x30] sm:$0xff]  ;;  %v1064_v12 = vld [vmem:[#allocation7 + $0x168] sm:$0xff] }
 0x10f   :  { %v4318_v22 = vpack.c.bf16 %v1028_v18, %v1025_v17  ;;  %v1061_v11 = vld [vmem:[#allocation7 + $0x150] sm:$0xff] }
 0x110   :  { %v4405_v17 = vpack.c.bf16 %v1064_v12, %v1061_v11 }
 0x1a2   :  { %v265_v27 = vpop.f32.mrb[0].mxu0 }
 0x1a3   :  { %v267_v29 = vpop.f32.mrb[1].mxu0 }
 0x1a4   :  { %647 = vmatprep.mubr.f32.mxu0 %v267_v29  ;;  %873 = vmatprep.mubr.f32.mxu1 %v267_v29  ;;  %v1030_v29 = vld [vmem:[#allocation7 + $0x58] sm:$0xff] }
 0x1a5   :  { %648 = vmatmul.mubr.f32.vlgmr.msra.gmra.mrb[16].mxu0 %v265_v27  ;;  %874 = vmatmul.mubr.f32.vlgmr.msra.gmra.mrb[8].mxu1 %v265_v27  ;;  %v1041_v27 = vld [vmem:[#allocation7 + $0xb0] sm:$0xff] }
 0x1a6   :  { %3257 = vmatpush1.bf16.msra.mxu0 %v3256_v28  ;;  %v271_v38 = vpop.f32.mrb[2].mxu0  ;;  %v4269_v39 = vpop.f32.mrb[0].mxu1  ;;  %3303 = vmatpush3.bf16.msra.mxu1 %v3300_v20  ;;  %v1035_v20 = vld [vmem:[#allocation7 + $0x80] sm:$0xff]  ;;  %v4336_v31 = vpack.c.bf16 %v1041_v27, %v1038_v26 }
 0x1a7   :  { %v273_v41 = vpop.f32.mrb[3].mxu0  ;;  %v4271_v42 = vpop.f32.mrb[1].mxu1  ;;  %3259 = vmatprep.subr.bf16.mxu0 %v3258_v30  ;;  %3305 = vmatprep.subr.bf16.mxu1 %v3304_v34  ;;  %v4322_v23 = vpack.c.bf16 %v1035_v20, %v1032_v19  ;;  %v1027_v28 = vld [vmem:[#allocation7 + $0x40] sm:$0xff]  ;;  %v4332_v30 = vpack.c.bf16 %v1034_v25, %v1031_v24  ;;  %v1066_v19 = vld [vmem:[#allocation7 + $0x178] sm:$0xff]  ;;  %v531_v25 = vld [vmem:[%s4806_s4] sm:$0x7] }
 0x1a8   :  { %653 = vmatprep.mubr.f32.mxu0 %v273_v41  ;;  %878 = vmatprep.mubr.f32.mxu1 %v273_v41  ;;  %v4339_v36 = vpack.c.bf16 %v1030_v29, %v1027_v28  ;;  %v1043_v41 = vld [vmem:[#allocation7 + $0xc0] sm:$0xff] }
 0x1a9   :  { %654 = vmatmul.mubr.f32.gmra.mrb[18].mxu0 %v271_v38  ;;  %879 = vmatmul.mubr.f32.gmra.mrb[10].mxu1 %v271_v38  ;;  %v1036_v38 = vld [vmem:[#allocation7 + $0x88] sm:$0xff] }
 0x1aa   :  { %v277_v52 = vpop.f32.mrb[4].mxu0  ;;  %v4278_v53 = vpop.f32.mrb[2].mxu1  ;;  %3261 = vmatpush1.bf16.msra.mxu0 %v3260_v40  ;;  %3307 = vmatpush3.bf16.msra.mxu1 %v3304_v34  ;;  %v1044_v34 = vld [vmem:[#allocation7 + $0xc8] sm:$0xff]  ;;  %v4355_v45 = vpack.c.bf16 %v1036_v38, %v1033_v37 }
 0x1ab   :  { %v279_v55 = vpop.f32.mrb[5].mxu0  ;;  %v4280_v47 = vpop.f32.mrb[3].mxu1  ;;  %3264 = vmatprep.subr.msk.bf16.mxu0 %vm4274_vm12, %v3262_v43  ;;  %3310 = vmatprep.subr.msk.bf16.mxu1 %vm4274_vm12, %v3308_v48  ;;  %v4352_v40 = vpack.c.bf16 %v1047_v35, %v1044_v34  ;;  %v1050_v43 = vld [vmem:[#allocation7 + $0xf8] sm:$0xff] }
 0x1ac   :  { %659 = vmatprep.mubr.f32.mxu0 %v279_v55  ;;  %883 = vmatprep.mubr.f32.mxu1 %v279_v55  ;;  %v4366_v51 = vpack.c.bf16 %v1053_v44, %v1050_v43  ;;  %v1059_v55 = vld [vmem:[#allocation7 + $0x140] sm:$0xff] }
 0x1ad   :  { %660 = vmatmul.mubr.f32.gmra.mrb[20].mxu0 %v277_v52  ;;  %884 = vmatmul.mubr.f32.gmra.mrb[12].mxu1 %v277_v52  ;;  %v1049_v52 = vld [vmem:[#allocation7 + $0xf0] sm:$0xff] }
 0x1ae   :  { %v283_v57 = vpop.f32.mrb[6].mxu0  ;;  %v4288_v58 = vpop.f32.mrb[4].mxu1  ;;  %3267 = vmatpush1.bf16.msk.msra.mxu0 %vm4274_vm12, %v3265_v54  ;;  %3313 = vmatpush3.bf16.msk.msra.mxu1 %vm4274_vm12, %v3308_v48  ;;  %v1039_v48 = vld [vmem:[#allocation7 + $0xa0] sm:$0xff]  ;;  %v1052_v54 = vld [vmem:[#allocation7 + $0x108] sm:$0xff] }
 0x1af   :  { %v285_v59 = vpop.f32.mrb[7].mxu0  ;;  %v4294_v60 = vpop.f32.mrb[5].mxu1  ;;  %3315 = vmatprep.subr.bf16.mxu0 %v4286_v56  ;;  %3346 = vmatprep.subr.bf16.mxu1 %v4075_v61 }
 0x1b0   :  { %665 = vmatprep.mubr.f32.mxu0 %v285_v59  ;;  %888 = vmatprep.mubr.f32.mxu1 %v285_v59  ;;  %v1048_v59 = vld [vmem:[#allocation7 + $0xe8] sm:$0xff] }
 0x1b1   :  { %666 = vmatmul.mubr.f32.gmra.mrb[22].mxu0 %v283_v57  ;;  %889 = vmatmul.mubr.f32.gmra.mrb[14].mxu1 %v283_v57  ;;  %v1045_v57 = vld [vmem:[#allocation7 + $0xd0] sm:$0xff] }
 0x1b2   :  { %v289_v62 = vpop.f32.mrb[8].mxu0  ;;  %v4298_v63 = vpop.f32.mrb[6].mxu1 }
 0x1b3   :  { %v291_v0 = vpop.f32.mrb[9].mxu0  ;;  %v4300_v2 = vpop.f32.mrb[7].mxu1 }
 0x1b4   :  { %671 = vmatprep.mubr.f32.mxu0 %v291_v0  ;;  %893 = vmatprep.mubr.f32.mxu1 %v291_v0 }
 0x1b5   :  { %672 = vmatmul.mubr.f32.gmra.mrb[24].mxu0 %v289_v62  ;;  %894 = vmatmul.mubr.f32.gmra.mrb[16].mxu1 %v289_v62  ;;  %v4379_v62 = vpack.c.bf16 %v1052_v54, %v1049_v52 }
 0x1b6   :  { %v295_v3 = vpop.f32.mrb[10].mxu0 }
 0x1b7   :  { %v297_v4 = vpop.f32.mrb[11].mxu0 }
 0x1b8   :  { %677 = vmatprep.mubr.f32.mxu0 %v297_v4  ;;  %898 = vmatprep.mubr.f32.mxu1 %v297_v4  ;;  %v1058_v4 = vld [vmem:[#allocation7 + $0x138] sm:$0xff] }
 0x1b9   :  { %678 = vmatmul.mubr.f32.gmra.mrb[26].mxu0 %v295_v3  ;;  %899 = vmatmul.mubr.f32.gmra.mrb[18].mxu1 %v295_v3  ;;  %v1055_v3 = vld [vmem:[#allocation7 + $0x120] sm:$0xff] }
 0x1ba   :  { %v301_v5 = vpop.f32.mrb[12].mxu0  ;;  %v4392_v9 = vpack.c.bf16 %v1058_v4, %v1055_v3 }
 0x1bb   :  { %v303_v6 = vpop.f32.mrb[13].mxu0 }
 0x1bc   :  { %683 = vmatprep.mubr.f32.mxu0 %v303_v6  ;;  %903 = vmatprep.mubr.f32.mxu1 %v303_v6  ;;  %v1065_v6 = vld [vmem:[#allocation7 + $0x170] sm:$0xff] }
 0x1bd   :  { %684 = vmatmul.mubr.f32.gmra.mrb[28].mxu0 %v301_v5  ;;  %904 = vmatmul.mubr.f32.gmra.mrb[20].mxu1 %v301_v5  ;;  %v1062_v5 = vld [vmem:[#allocation7 + $0x158] sm:$0xff] }
 0x1be   :  { %v307_v7 = vpop.f32.mrb[14].mxu0  ;;  %v4395_v10 = vpack.c.bf16 %v1065_v6, %v1062_v5 }
 0x1bf   :  { %v309_v8 = vpop.f32.mrb[15].mxu0 }
 0x1c0   :  { %689 = vmatprep.mubr.f32.mxu0 %v309_v8  ;;  %908 = vmatprep.mubr.f32.mxu1 %v309_v8  ;;  %v1054_v8 = vld [vmem:[#allocation7 + $0x118] sm:$0xff] }
 0x1c1   :  { %690 = vmatmul.mubr.f32.gmra.mrb[30].mxu0 %v307_v7  ;;  %909 = vmatmul.mubr.f32.gmra.mrb[22].mxu1 %v307_v7  ;;  %v1051_v7 = vld [vmem:[#allocation7 + $0x100] sm:$0xff] }
 0x1c2   :  { %2839 = vmatprep.mubr.msk.f32.mxu1 %vm548_vm13, %v4271_v42  ;;  %760 = vmatprep.mubr.f32.mxu0 %v4073_v1  ;;  %v4398_v13 = vpack.c.bf16 %v1054_v8, %v1051_v7 }
 0x1c5   :  { %2529 = vmatmul.mubr.msk.f32.vlgmr.msra.gmra.mrb[16].mxu0 %vm548_vm13, %v4271_v42  ;;  %2840 = vmatmul.mubr.msk.f32.vlgmr.msra.gmra.mrb[24].mxu1 %vm548_vm13, %v4269_v39  ;;  %v1046_v42 = vld [vmem:[#allocation7 + $0xd8] sm:$0xff] }
 0x1c6   :  { %3317 = vmatpush1.bf16.msra.mxu0 %v4305_v15  ;;  %2842 = vmatprep.mubr.msk.f32.mxu1 %vm548_vm13, %v4280_v47  ;;  %v4363_v50 = vpack.c.bf16 %v1046_v42, %v1043_v41 }
 0x1c7   :  { %766 = vmatprep.mubr.f32.mxu0 %v4073_v1  ;;  %3319 = vmatprep.subr.bf16.mxu0 %v4307_v16 }
 0x1c8   :  { %3348 = vmatpush3.bf16.msra.mxu1 %v4309_v21 }
 0x1c9   :  { %2530 = vmatmul.mubr.msk.f32.gmra.mrb[18].mxu0 %vm548_vm13, %v4269_v39  ;;  %2843 = vmatmul.mubr.msk.f32.gmra.mrb[26].mxu1 %vm548_vm13, %v4278_v53  ;;  %v4348_v39 = vpack.c.bf16 %v1040_v33, %v1037_v32 }
 0x1ca   :  { %3321 = vmatpush1.bf16.msra.mxu0 %v4318_v22  ;;  %2845 = vmatprep.mubr.msk.f32.mxu1 %vm548_vm13, %v4294_v60 }
 0x1cb   :  { %772 = vmatprep.mubr.f32.mxu0 %v4073_v1  ;;  %3323 = vmatprep.subr.bf16.mxu0 %v4322_v23 }
 0x1cc   :  { %3349 = vmatprep.subr.bf16.mxu1 %v4075_v61 }
 0x1cd   :  { %2531 = vmatmul.mubr.msk.f32.gmra.mrb[20].mxu0 %vm548_vm13, %v4280_v47  ;;  %2846 = vmatmul.mubr.msk.f32.gmra.mrb[28].mxu1 %vm548_vm13, %v4288_v58  ;;  %v4370_v47 = vpack.c.bf16 %v1042_v49, %v1039_v48 }
 0x1ce   :  { %3325 = vmatpush1.bf16.msra.mxu0 %v4332_v30  ;;  %2848 = vmatprep.mubr.msk.f32.mxu1 %vm548_vm13, %v4300_v2 }
 0x1cf   :  { %778 = vmatprep.mubr.f32.mxu0 %v4073_v1  ;;  %3327 = vmatprep.subr.bf16.mxu0 %v4336_v31 }
 0x1d0   :  { %3351 = vmatpush3.bf16.msra.mxu1 %v4339_v36 }
 0x1d1   :  { %2532 = vmatmul.mubr.msk.f32.gmra.mrb[22].mxu0 %vm548_vm13, %v4278_v53  ;;  %2849 = vmatmul.mubr.msk.f32.gmra.mrb[30].mxu1 %vm548_vm13, %v4298_v63  ;;  %v1056_v53 = vld [vmem:[#allocation7 + $0x128] sm:$0xff] }
 0x1d2   :  { %3329 = vmatpush1.bf16.msra.mxu0 %v4348_v39  ;;  %784 = vmatprep.mubr.f32.mxu0 %v4073_v1  ;;  %v4382_v0 = vpack.c.bf16 %v1059_v55, %v1056_v53 }
 0x1d3   :  { %3331 = vmatprep.subr.bf16.mxu0 %v4352_v40  ;;  %3352 = vmatprep.subr.bf16.mxu1 %v4075_v61 }
 0x1d4   :  { %3354 = vmatpush3.bf16.msra.mxu1 %v4355_v45  ;;  %2883 = vmatprep.mubr.msk.f32.mxu1 %vm4076_vm14, %v4073_v1 }
 0x1d5   :  { %2533 = vmatmul.mubr.msk.f32.gmra.mrb[24].mxu0 %vm548_vm13, %v4294_v60  ;;  %3355 = vmatprep.subr.bf16.mxu1 %v4075_v61  ;;  %v4385_v60 = vpack.c.bf16 %v1048_v59, %v1045_v57 }
 0x1d6   :  { %3333 = vmatpush1.bf16.msra.mxu0 %v4363_v50  ;;  %790 = vmatprep.mubr.f32.mxu0 %v4073_v1 }
 0x1d7   :  { %3335 = vmatprep.subr.bf16.mxu0 %v4366_v51 }
 0x1d8   :  { %3357 = vmatpush3.bf16.msra.mxu1 %v4370_v47 }
 0x1d9   :  { %2534 = vmatmul.mubr.msk.f32.gmra.mrb[26].mxu0 %vm548_vm13, %v4288_v58  ;;  %3358 = vmatprep.subr.bf16.mxu1 %v4075_v61  ;;  %v1057_v58 = vld [vmem:[#allocation7 + $0x130] sm:$0xff] }
 0x1da   :  { %3337 = vmatpush1.bf16.msra.mxu0 %v4379_v62  ;;  %796 = vmatprep.mubr.f32.mxu0 %v4073_v1  ;;  %v4409_v18 = vpack.c.bf16 %v1060_v14, %v1057_v58 }
 0x1db   :  { %3339 = vmatprep.subr.bf16.mxu0 %v4382_v0 }
 0x1dc   :  { %3360 = vmatpush3.bf16.msra.mxu1 %v4385_v60 }
 0x1dd   :  { %2535 = vmatmul.mubr.msk.f32.gmra.mrb[28].mxu0 %vm548_vm13, %v4300_v2  ;;  %3361 = vmatprep.subr.bf16.mxu1 %v4075_v61  ;;  %v1063_v2 = vld [vmem:[#allocation7 + $0x160] sm:$0xff] }
 0x1de   :  { %3341 = vmatpush1.bf16.msra.mxu0 %v4392_v9  ;;  %802 = vmatprep.mubr.f32.mxu0 %v4073_v1  ;;  %v4418_v20 = vpack.c.bf16 %v1066_v19, %v1063_v2 }
 0x1df   :  { %3343 = vmatprep.subr.bf16.mxu0 %v4395_v10 }
 0x1e0   :  { %3363 = vmatpush3.bf16.msra.mxu1 %v4398_v13 }
 0x1e1   :  { %2536 = vmatmul.mubr.msk.f32.gmra.mrb[30].mxu0 %vm548_vm13, %v4298_v63  ;;  %3364 = vmatprep.subr.bf16.mxu1 %v4075_v61  ;;  %v4461_v63 = vshrl.u32 %v85_v46, 7 }
 0x1e2   :  { %3345 = vmatpush1.bf16.msra.mxu0 %v4405_v17  ;;  %1148 = vmatprep.mubr.f32.mxu0 %v4073_v1 }
 0x1e3   :  { %3371 = vmatprep.subr.bf16.mxu0 %v4286_v56  ;;  %v543_v24 = vsub.s32 2, %v4461_v63 }
 0x1e4   :  { %3366 = vmatpush3.bf16.msra.mxu1 %v4409_v18 }
 0x1e5   :  { %1149 = vmatmul.mubr.f32.vlgmr.msra.gmra.mrb[16].mxu0 %v4073_v1  ;;  %3367 = vmatprep.subr.bf16.mxu1 %v4075_v61  ;;  %v544_v27 = vrot.slane %v531_v25, %v543_v24 }
 0x1e6   :  { %3373 = vmatpush1.bf16.msra.mxu0 %v4305_v15  ;;  %1311 = vmatprep.mubr.f32.mxu0 %v4073_v1 }
 0x1e7   :  { %3375 = vmatprep.subr.bf16.mxu0 %v4307_v16 }
 0x1e8   :  { %3369 = vmatpush3.bf16.msra.mxu1 %v4418_v20 }
 0x1e9   :  { %3402 = vmatprep.subr.bf16.mxu1 %v4075_v61 }
 0x1ea   :  { %3377 = vmatpush1.bf16.msra.mxu0 %v4318_v22 }
 0x1eb   :  { %2884 = vmatmul.mubr.f32.vlgmr.msra.gmra.mrb[32].mxu1 %v4073_v1  ;;  %3379 = vmatprep.subr.bf16.mxu0 %v4322_v23 }
 0x1ec   :  { %3404 = vmatpush3.bf16.msra.mxu1 %v4309_v21  ;;  %2918 = vmatprep.mubr.msk.f32.mxu1 %vm4076_vm14, %v4073_v1 }
 0x1ed   :  { %3405 = vmatprep.subr.bf16.mxu1 %v4075_v61 }
 0x1ee   :  { %3381 = vmatpush1.bf16.msra.mxu0 %v4332_v30 }
 0x1ef   :  { %3383 = vmatprep.subr.bf16.mxu0 %v4336_v31 }
 0x1f0   :  { %3407 = vmatpush3.bf16.msra.mxu1 %v4339_v36 }
 0x1f1   :  { %3408 = vmatprep.subr.bf16.mxu1 %v4075_v61 }
 0x1f2   :  { %3385 = vmatpush1.bf16.msra.mxu0 %v4348_v39 }
 0x1f3   :  { %3387 = vmatprep.subr.bf16.mxu0 %v4352_v40 }
 0x1f4   :  { %3410 = vmatpush3.bf16.msra.mxu1 %v4355_v45 }
 0x1f5   :  { %3411 = vmatprep.subr.bf16.mxu1 %v4075_v61 }
 0x1f6   :  { %3389 = vmatpush1.bf16.msra.mxu0 %v4363_v50 }
 0x1f7   :  { %3391 = vmatprep.subr.bf16.mxu0 %v4366_v51 }
 0x1f8   :  { %3413 = vmatpush3.bf16.msra.mxu1 %v4370_v47 }
 0x1f9   :  { %3414 = vmatprep.subr.bf16.mxu1 %v4075_v61 }
 0x1fa   :  { %3393 = vmatpush1.bf16.msra.mxu0 %v4379_v62 }
 0x1fb   :  { %3395 = vmatprep.subr.bf16.mxu0 %v4382_v0 }
 0x1fc   :  { %3416 = vmatpush3.bf16.msra.mxu1 %v4385_v60 }
 0x1fd   :  { %3417 = vmatprep.subr.bf16.mxu1 %v4075_v61 }
 0x1fe   :  { %3397 = vmatpush1.bf16.msra.mxu0 %v4392_v9 }
 0x1ff   :  { %3399 = vmatprep.subr.bf16.mxu0 %v4395_v10 }
 0x200   :  { %3419 = vmatpush3.bf16.msra.mxu1 %v4398_v13 }
 0x201   :  { %3420 = vmatprep.subr.bf16.mxu1 %v4075_v61 }
 0x202   :  { %3401 = vmatpush1.bf16.msra.mxu0 %v4405_v17 }
 0x203   :  { %3427 = vmatprep.subr.bf16.mxu0 %v4286_v56 }
 0x204   :  { %3422 = vmatpush3.bf16.msra.mxu1 %v4409_v18 }
 0x205   :  { %3423 = vmatprep.subr.bf16.mxu1 %v4075_v61 }
 0x208   :  { %3425 = vmatpush3.bf16.msra.mxu1 %v4418_v20 }
 0x209   :  { %3458 = vmatprep.subr.bf16.mxu1 %v4075_v61 }
 0x278   :  { %v2610_v26 = vpop.f32.mrb[8].mxu1 }
 0x279   :  { %v2611_v28 = vpop.f32.mrb[9].mxu1 }
 0x27a   :  { %v2612_v29 = vadd.f32 %v2611_v28, %v2610_v26 }
 0x27c   :  { %v2613_v32 = vpop.f32.mrb[10].mxu1  ;;  %v876_v33 = vadd.f32 %v2612_v29, %v544_v27 }
 0x27d   :  { %v2614_v34 = vpop.f32.mrb[11].mxu1 }
 0x27e   :  { %v2615_v35 = vadd.f32 %v2614_v34, %v2613_v32 }
 0x280   :  { %v2616_v37 = vpop.f32.mrb[12].mxu1  ;;  %v881_v38 = vadd.f32 %v2615_v35, %v544_v27 }
 0x281   :  { %v2617_v46 = vpop.f32.mrb[13].mxu1 }
 0x282   :  { %v2618_v41 = vadd.f32 %v2617_v46, %v2616_v37 }
 0x284   :  { %v2619_v42 = vpop.f32.mrb[14].mxu1  ;;  %v886_v43 = vadd.f32 %v2618_v41, %v544_v27 }
 0x285   :  { %v2620_v44 = vpop.f32.mrb[15].mxu1 }
 0x286   :  { %v2621_v48 = vadd.f32 %v2620_v44, %v2619_v42 }
 0x288   :  { %v2622_v49 = vpop.f32.mrb[16].mxu1  ;;  %v891_v52 = vadd.f32 %v2621_v48, %v544_v27 }
 0x289   :  { %v2623_v54 = vpop.f32.mrb[17].mxu1 }
 0x28a   :  { %v2624_v53 = vadd.f32 %v2623_v54, %v2622_v49  ;;  %v1067_v49 = vld [vmem:[%s4807_s5] sm:$0x7] }
 0x28c   :  { %v2625_v55 = vpop.f32.mrb[18].mxu1  ;;  %v896_v57 = vadd.f32 %v2624_v53, %v544_v27 }
 0x28d   :  { %v2626_v59 = vpop.f32.mrb[19].mxu1 }
 0x28e   :  { %v2627_v3 = vadd.f32 %v2626_v59, %v2625_v55 }
 0x290   :  { %v2628_v4 = vpop.f32.mrb[20].mxu1  ;;  %v901_v5 = vadd.f32 %v2627_v3, %v544_v27 }
 0x291   :  { %v2629_v6 = vpop.f32.mrb[21].mxu1 }
 0x292   :  { %v2630_v7 = vadd.f32 %v2629_v6, %v2628_v4 }
 0x294   :  { %v2631_v8 = vpop.f32.mrb[22].mxu1  ;;  %v906_v11 = vadd.f32 %v2630_v7, %v544_v27 }
 0x295   :  { %v2632_v12 = vpop.f32.mrb[23].mxu1 }
 0x296   :  { %v2633_v58 = vadd.f32 %v2632_v12, %v2631_v8 }
 0x298   :  { %v2841_v14 = vpop.f32.mrb[24].mxu1  ;;  %v911_v2 = vadd.f32 %v2633_v58, %v544_v27 }
 0x299   :  { %v4469_v19 = vadd.f32 %v2841_v14, %v881_v38  ;;  %v980_v26 = vpop.f32.mrb[25].mxu1 }
 0x29a   :  { %v981_v28 = vadd.f32 %v980_v26, %v876_v33  ;;  %v535_v33 = vsub.s32 0, %v4461_v63 }
 0x29c   :  { %v2844_v29 = vpop.f32.mrb[26].mxu1  ;;  %v1072_v54 = vrot.slane %v1067_v49, %v535_v33 }
 0x29d   :  { %v4471_v32 = vadd.f32 %v2844_v29, %v891_v52  ;;  %v990_v34 = vpop.f32.mrb[27].mxu1  ;;  %v536_v52 = vrot.slane %v531_v25, %v535_v33 }
 0x29e   :  { %v4473_v35 = vadd.f32 %v990_v34, %v886_v43  ;;  %v539_v43 = vsub.s32 1, %v4461_v63 }
 0x2a0   :  { %v2847_v37 = vpop.f32.mrb[28].mxu1  ;;  %v540_v53 = vrot.slane %v531_v25, %v539_v43  ;;  %v1076_v55 = vrot.slane %v1067_v49, %v539_v43  ;;  %v4496_v25 = vrot.slane %v1067_v49, %v543_v24 }
 0x2a1   :  { %v4475_v46 = vadd.f32 %v2847_v37, %v901_v5  ;;  %v1000_v41 = vpop.f32.mrb[29].mxu1 }
 0x2a2   :  { %v4477_v42 = vadd.f32 %v1000_v41, %v896_v57  ;;  %v4488_v57 = vadd.f32 %v1072_v54, %v536_v52  ;;  %v4490_v3 = vadd.f32 %v1076_v55, %v540_v53 }
 0x2a4   :  { %v2850_v44 = vpop.f32.mrb[30].mxu1 }
 0x2a5   :  { %v4479_v48 = vadd.f32 %v2850_v44, %v911_v2  ;;  %v1010_v27 = vpop.f32.mrb[31].mxu1 }
 0x2a6   :  { %v4481_v38 = vadd.f32 %v1010_v27, %v906_v11 }
 0x2b8   :  { %v1150_v59 = vpop.f32.mrb[16].mxu0 }
 0x2b9   :  { %v3787_v4 = vadd.f32 %v4488_v57, %v1150_v59  ;;  %v1152_v5 = vpop.f32.mrb[17].mxu0 }
 0x2ba   :  { %v3789_v7 = vadd.f32 %v4490_v3, %v1152_v5 }
 0x2bb   :  { %v2546_v6 = vmul.f32 -1.442695, %v3787_v4 }
 0x2bc   :  { %v2547_v12 = vmul.f32 -1.442695, %v3789_v7 }
 0x2bd   :  { %3866 = vpow2.f32 %v2546_v6 }
 0x2be   :  { %v1221_v8 = vpop.f32.mrb[32].mxu1  ;;  %3868 = vpow2.f32 %v2547_v12 }
 0x2bf   :  { %v2885_v11 = vpop.f32.mrb[33].mxu1  ;;  %v1222_v29 = vadd.f32 %v1221_v8, %v4496_v25 }
 0x2c7   :  { %v3867_v58 = vpop.eup %3866 }
 0x2c8   :  { %v1229_v14 = vadd.f32 1.0, %v3867_v58  ;;  %v3869_v2 = vpop.eup %3868 }
 0x2c9   :  { %v1236_v26 = vadd.f32 1.0, %v3869_v2 }
 0x2ca   :  { %3870 = vrcp.f32 %v1229_v14 }
 0x2cb   :  { %3872 = vrcp.f32 %v1236_v26 }
 0x2d4   :  { %v3871_v34 = vpop.eup %3870 }
 0x2d5   :  { %v1239_v37 = vmul.f32 %v3871_v34, %v1222_v29  ;;  %v3873_v44 = vpop.eup %3872 }
 0x2d6   :  { %v1242_v27 = vsub.f32 1.0, %v3873_v44  ;;  %v1244_v52 = vmul.f32 0.0, %v3873_v44 }
 0x2d7   :  { %v1240_v41 = vadd.f32 %v1239_v37, %v981_v28 }
 0x2d9   :  { %3874 = vtanh.f32 %v1240_v41 }
 0x2e3   :  { %v3875_v33 = vpop.eup %3874 }
 0x2e4   :  { %v1243_v43 = vmul.f32 %v3875_v33, %v1242_v27 }
 0x2e6   :  { %v4499_v54 = vadd.f32 %v1244_v52, %v1243_v43 }
 0x2e8   :  { %1312 = vmatmul.mubr.f32.vlgmr.msra.gmra.mrb[18].mxu0 %v4499_v54  ;;  %2919 = vmatmul.mubr.f32.vlgmr.msra.gmra.mrb[34].mxu1 %v4499_v54 }
 0x2e9   :  { %3429 = vmatpush1.bf16.msra.mxu0 %v4305_v15  ;;  %3460 = vmatpush3.bf16.msra.mxu1 %v4309_v21 }
 0x2ea   :  { %3431 = vmatprep.subr.bf16.mxu0 %v4307_v16  ;;  %3461 = vmatprep.subr.bf16.mxu1 %v4075_v61 }
 0x2eb   :  { %1474 = vmatprep.mubr.f32.mxu0 %v4073_v1  ;;  %2953 = vmatprep.mubr.msk.f32.mxu1 %vm4076_vm14, %v4073_v1 }
 0x2ed   :  { %3433 = vmatpush1.bf16.msra.mxu0 %v4318_v22  ;;  %3463 = vmatpush3.bf16.msra.mxu1 %v4339_v36 }
 0x2ee   :  { %3435 = vmatprep.subr.bf16.mxu0 %v4322_v23  ;;  %3464 = vmatprep.subr.bf16.mxu1 %v4075_v61 }
 0x2f1   :  { %3437 = vmatpush1.bf16.msra.mxu0 %v4332_v30  ;;  %3466 = vmatpush3.bf16.msra.mxu1 %v4355_v45 }
 0x2f2   :  { %3439 = vmatprep.subr.bf16.mxu0 %v4336_v31  ;;  %3467 = vmatprep.subr.bf16.mxu1 %v4075_v61 }
 0x2f5   :  { %3441 = vmatpush1.bf16.msra.mxu0 %v4348_v39  ;;  %3469 = vmatpush3.bf16.msra.mxu1 %v4370_v47 }
 0x2f6   :  { %3443 = vmatprep.subr.bf16.mxu0 %v4352_v40  ;;  %3470 = vmatprep.subr.bf16.mxu1 %v4075_v61 }
 0x2f9   :  { %3445 = vmatpush1.bf16.msra.mxu0 %v4363_v50  ;;  %3472 = vmatpush3.bf16.msra.mxu1 %v4385_v60 }
 0x2fa   :  { %3447 = vmatprep.subr.bf16.mxu0 %v4366_v51  ;;  %3473 = vmatprep.subr.bf16.mxu1 %v4075_v61 }
 0x2fd   :  { %3449 = vmatpush1.bf16.msra.mxu0 %v4379_v62  ;;  %3475 = vmatpush3.bf16.msra.mxu1 %v4398_v13 }
 0x2fe   :  { %3451 = vmatprep.subr.bf16.mxu0 %v4382_v0  ;;  %3476 = vmatprep.subr.bf16.mxu1 %v4075_v61 }
 0x301   :  { %3453 = vmatpush1.bf16.msra.mxu0 %v4392_v9  ;;  %3478 = vmatpush3.bf16.msra.mxu1 %v4409_v18 }
 0x302   :  { %3455 = vmatprep.subr.bf16.mxu0 %v4395_v10  ;;  %3479 = vmatprep.subr.bf16.mxu1 %v4075_v61 }
 0x305   :  { %3457 = vmatpush1.bf16.msra.mxu0 %v4405_v17  ;;  %3481 = vmatpush3.bf16.msra.mxu1 %v4418_v20 }
 0x306   :  { %3483 = vmatprep.subr.bf16.mxu0 %v4286_v56  ;;  %3514 = vmatprep.subr.bf16.mxu1 %v4075_v61 }
 0x3bb   :  { %v1313_v63 = vpop.f32.mrb[18].mxu0  ;;  %v1384_v24 = vpop.f32.mrb[34].mxu1 }
 0x3bc   :  { %v3791_v28 = vadd.f32 %v4488_v57, %v1313_v63  ;;  %v1315_v49 = vpop.f32.mrb[19].mxu0  ;;  %v2920_v53 = vpop.f32.mrb[35].mxu1  ;;  %v1385_v11 = vadd.f32 %v1384_v24, %v4496_v25 }
 0x3bd   :  { %v3793_v59 = vadd.f32 %v4490_v3, %v1315_v49 }
 0x3be   :  { %v2548_v55 = vmul.f32 -1.442695, %v3791_v28 }
 0x3bf   :  { %v2549_v4 = vmul.f32 -1.442695, %v3793_v59 }
 0x3c0   :  { %3876 = vpow2.f32 %v2548_v55 }
 0x3c1   :  { %3878 = vpow2.f32 %v2549_v4 }
 0x3ca   :  { %v3877_v5 = vpop.eup %3876 }
 0x3cb   :  { %v1392_v6 = vadd.f32 1.0, %v3877_v5  ;;  %v3879_v7 = vpop.eup %3878 }
 0x3cc   :  { %v1399_v8 = vadd.f32 1.0, %v3879_v7 }
 0x3cd   :  { %3880 = vrcp.f32 %v1392_v6 }
 0x3ce   :  { %3882 = vrcp.f32 %v1399_v8 }
 0x3d7   :  { %v3881_v12 = vpop.eup %3880 }
 0x3d8   :  { %v1402_v58 = vmul.f32 %v3881_v12, %v1385_v11  ;;  %v3883_v2 = vpop.eup %3882 }
 0x3d9   :  { %v1405_v26 = vsub.f32 1.0, %v3883_v2  ;;  %v1407_v37 = vmul.f32 %v3883_v2, %v4499_v54 }
 0x3da   :  { %v1403_v14 = vadd.f32 %v1402_v58, %v4469_v19 }
 0x3dc   :  { %3884 = vtanh.f32 %v1403_v14 }
 0x3e6   :  { %v3885_v29 = vpop.eup %3884 }
 0x3e7   :  { %v1406_v34 = vmul.f32 %v3885_v29, %v1405_v26 }
 0x3e9   :  { %v4543_v41 = vadd.f32 %v1407_v37, %v1406_v34 }
 0x3eb   :  { %1475 = vmatmul.mubr.f32.vlgmr.msra.gmra.mrb[20].mxu0 %v4543_v41  ;;  %2954 = vmatmul.mubr.f32.vlgmr.msra.gmra.mrb[36].mxu1 %v4543_v41 }
 0x3ec   :  { %3485 = vmatpush1.bf16.msra.mxu0 %v4305_v15  ;;  %3516 = vmatpush3.bf16.msra.mxu1 %v4309_v21 }
 0x3ed   :  { %3487 = vmatprep.subr.bf16.mxu0 %v4307_v16  ;;  %3517 = vmatprep.subr.bf16.mxu1 %v4075_v61 }
 0x3ee   :  { %1637 = vmatprep.mubr.f32.mxu0 %v4073_v1  ;;  %2988 = vmatprep.mubr.msk.f32.mxu1 %vm4076_vm14, %v4073_v1 }
 0x3f0   :  { %3489 = vmatpush1.bf16.msra.mxu0 %v4318_v22  ;;  %3519 = vmatpush3.bf16.msra.mxu1 %v4339_v36 }
 0x3f1   :  { %3491 = vmatprep.subr.bf16.mxu0 %v4322_v23  ;;  %3520 = vmatprep.subr.bf16.mxu1 %v4075_v61 }
 0x3f4   :  { %3493 = vmatpush1.bf16.msra.mxu0 %v4332_v30  ;;  %3522 = vmatpush3.bf16.msra.mxu1 %v4355_v45 }
 0x3f5   :  { %3495 = vmatprep.subr.bf16.mxu0 %v4336_v31  ;;  %3523 = vmatprep.subr.bf16.mxu1 %v4075_v61 }
 0x3f8   :  { %3497 = vmatpush1.bf16.msra.mxu0 %v4348_v39  ;;  %3525 = vmatpush3.bf16.msra.mxu1 %v4370_v47 }
 0x3f9   :  { %3499 = vmatprep.subr.bf16.mxu0 %v4352_v40  ;;  %3526 = vmatprep.subr.bf16.mxu1 %v4075_v61 }
 0x3fc   :  { %3501 = vmatpush1.bf16.msra.mxu0 %v4363_v50  ;;  %3528 = vmatpush3.bf16.msra.mxu1 %v4385_v60 }
 0x3fd   :  { %3503 = vmatprep.subr.bf16.mxu0 %v4366_v51  ;;  %3529 = vmatprep.subr.bf16.mxu1 %v4075_v61 }
 0x400   :  { %3505 = vmatpush1.bf16.msra.mxu0 %v4379_v62  ;;  %3531 = vmatpush3.bf16.msra.mxu1 %v4398_v13 }
 0x401   :  { %3507 = vmatprep.subr.bf16.mxu0 %v4382_v0  ;;  %3532 = vmatprep.subr.bf16.mxu1 %v4075_v61 }
 0x404   :  { %3509 = vmatpush1.bf16.msra.mxu0 %v4392_v9  ;;  %3534 = vmatpush3.bf16.msra.mxu1 %v4409_v18 }
 0x405   :  { %3511 = vmatprep.subr.bf16.mxu0 %v4395_v10  ;;  %3535 = vmatprep.subr.bf16.mxu1 %v4075_v61 }
 0x408   :  { %3513 = vmatpush1.bf16.msra.mxu0 %v4405_v17  ;;  %3537 = vmatpush3.bf16.msra.mxu1 %v4418_v20 }
 0x409   :  { %3539 = vmatprep.subr.bf16.mxu0 %v4286_v56  ;;  %3570 = vmatprep.subr.bf16.mxu1 %v4075_v61 }
 0x4be   :  { %v1476_v19 = vpop.f32.mrb[20].mxu0  ;;  %v1547_v44 = vpop.f32.mrb[36].mxu1 }
 0x4bf   :  { %v3795_v27 = vadd.f32 %v4488_v57, %v1476_v19  ;;  %v1478_v33 = vpop.f32.mrb[21].mxu0  ;;  %v2955_v43 = vpop.f32.mrb[37].mxu1  ;;  %v1548_v59 = vadd.f32 %v1547_v44, %v4496_v25 }
 0x4c0   :  { %v3797_v63 = vadd.f32 %v4490_v3, %v1478_v33 }
 0x4c1   :  { %v2550_v52 = vmul.f32 -1.442695, %v3795_v27 }
 0x4c2   :  { %v2551_v24 = vmul.f32 -1.442695, %v3797_v63 }
 0x4c3   :  { %3886 = vpow2.f32 %v2550_v52 }
 0x4c4   :  { %3888 = vpow2.f32 %v2551_v24 }
 0x4cd   :  { %v3887_v28 = vpop.eup %3886 }
 0x4ce   :  { %v1555_v49 = vadd.f32 1.0, %v3887_v28  ;;  %v3889_v53 = vpop.eup %3888 }
 0x4cf   :  { %v1562_v55 = vadd.f32 1.0, %v3889_v53 }
 0x4d0   :  { %3890 = vrcp.f32 %v1555_v49 }
 0x4d1   :  { %3892 = vrcp.f32 %v1562_v55 }
 0x4da   :  { %v3891_v4 = vpop.eup %3890 }
 0x4db   :  { %v1565_v5 = vmul.f32 %v3891_v4, %v1548_v59  ;;  %v3893_v7 = vpop.eup %3892 }
 0x4dc   :  { %v1568_v8 = vsub.f32 1.0, %v3893_v7  ;;  %v1570_v58 = vmul.f32 %v3893_v7, %v4543_v41 }
 0x4dd   :  { %v1566_v6 = vadd.f32 %v1565_v5, %v4473_v35 }
 0x4df   :  { %3894 = vtanh.f32 %v1566_v6 }
 0x4e9   :  { %v3895_v11 = vpop.eup %3894 }
 0x4ea   :  { %v1569_v12 = vmul.f32 %v3895_v11, %v1568_v8 }
 0x4ec   :  { %v4587_v14 = vadd.f32 %v1570_v58, %v1569_v12 }
 0x4ee   :  { %1638 = vmatmul.mubr.f32.vlgmr.msra.gmra.mrb[22].mxu0 %v4587_v14  ;;  %2989 = vmatmul.mubr.f32.vlgmr.msra.gmra.mrb[38].mxu1 %v4587_v14 }
 0x4ef   :  { %3541 = vmatpush1.bf16.msra.mxu0 %v4305_v15  ;;  %3572 = vmatpush3.bf16.msra.mxu1 %v4309_v21 }
 0x4f0   :  { %3543 = vmatprep.subr.bf16.mxu0 %v4307_v16  ;;  %3573 = vmatprep.subr.bf16.mxu1 %v4075_v61 }
 0x4f1   :  { %1800 = vmatprep.mubr.f32.mxu0 %v4073_v1  ;;  %3023 = vmatprep.mubr.msk.f32.mxu1 %vm4076_vm14, %v4073_v1 }
 0x4f3   :  { %3545 = vmatpush1.bf16.msra.mxu0 %v4318_v22  ;;  %3575 = vmatpush3.bf16.msra.mxu1 %v4339_v36 }
 0x4f4   :  { %3547 = vmatprep.subr.bf16.mxu0 %v4322_v23  ;;  %3576 = vmatprep.subr.bf16.mxu1 %v4075_v61 }
 0x4f7   :  { %3549 = vmatpush1.bf16.msra.mxu0 %v4332_v30  ;;  %3578 = vmatpush3.bf16.msra.mxu1 %v4355_v45 }
 0x4f8   :  { %3551 = vmatprep.subr.bf16.mxu0 %v4336_v31  ;;  %3579 = vmatprep.subr.bf16.mxu1 %v4075_v61 }
 0x4fb   :  { %3553 = vmatpush1.bf16.msra.mxu0 %v4348_v39  ;;  %3581 = vmatpush3.bf16.msra.mxu1 %v4370_v47 }
 0x4fc   :  { %3555 = vmatprep.subr.bf16.mxu0 %v4352_v40  ;;  %3582 = vmatprep.subr.bf16.mxu1 %v4075_v61 }
 0x4ff   :  { %3557 = vmatpush1.bf16.msra.mxu0 %v4363_v50  ;;  %3584 = vmatpush3.bf16.msra.mxu1 %v4385_v60 }
 0x500   :  { %3559 = vmatprep.subr.bf16.mxu0 %v4366_v51  ;;  %3585 = vmatprep.subr.bf16.mxu1 %v4075_v61 }
 0x503   :  { %3561 = vmatpush1.bf16.msra.mxu0 %v4379_v62  ;;  %3587 = vmatpush3.bf16.msra.mxu1 %v4398_v13 }
 0x504   :  { %3563 = vmatprep.subr.bf16.mxu0 %v4382_v0  ;;  %3588 = vmatprep.subr.bf16.mxu1 %v4075_v61 }
 0x507   :  { %3565 = vmatpush1.bf16.msra.mxu0 %v4392_v9  ;;  %3590 = vmatpush3.bf16.msra.mxu1 %v4409_v18 }
 0x508   :  { %3567 = vmatprep.subr.bf16.mxu0 %v4395_v10  ;;  %3591 = vmatprep.subr.bf16.mxu1 %v4075_v61 }
 0x50b   :  { %3569 = vmatpush1.bf16.msra.mxu0 %v4405_v17  ;;  %3593 = vmatpush3.bf16.msra.mxu1 %v4418_v20 }
 0x50c   :  { %3595 = vmatprep.subr.bf16.mxu0 %v4286_v56  ;;  %3626 = vmatprep.subr.bf16.mxu1 %v4075_v61 }
 0x5c1   :  { %v1639_v35 = vpop.f32.mrb[22].mxu0  ;;  %v1710_v2 = vpop.f32.mrb[38].mxu1 }
 0x5c2   :  { %v3799_v26 = vadd.f32 %v4488_v57, %v1639_v35  ;;  %v1641_v29 = vpop.f32.mrb[23].mxu0  ;;  %v2990_v34 = vpop.f32.mrb[39].mxu1  ;;  %v1711_v63 = vadd.f32 %v1710_v2, %v4496_v25 }
 0x5c3   :  { %v3801_v19 = vadd.f32 %v4490_v3, %v1641_v29 }
 0x5c4   :  { %v2552_v37 = vmul.f32 -1.442695, %v3799_v26 }
 0x5c5   :  { %v2553_v44 = vmul.f32 -1.442695, %v3801_v19 }
 0x5c6   :  { %3896 = vpow2.f32 %v2552_v37 }
 0x5c7   :  { %3898 = vpow2.f32 %v2553_v44 }
 0x5d0   :  { %v3897_v27 = vpop.eup %3896 }
 0x5d1   :  { %v1718_v33 = vadd.f32 1.0, %v3897_v27  ;;  %v3899_v43 = vpop.eup %3898 }
 0x5d2   :  { %v1725_v52 = vadd.f32 1.0, %v3899_v43 }
 0x5d3   :  { %3900 = vrcp.f32 %v1718_v33 }
 0x5d4   :  { %3902 = vrcp.f32 %v1725_v52 }
 0x5dd   :  { %v3901_v24 = vpop.eup %3900 }
 0x5de   :  { %v1728_v28 = vmul.f32 %v3901_v24, %v1711_v63  ;;  %v3903_v53 = vpop.eup %3902 }
 0x5df   :  { %v1731_v55 = vsub.f32 1.0, %v3903_v53  ;;  %v1733_v5 = vmul.f32 %v3903_v53, %v4587_v14 }
 0x5e0   :  { %v1729_v49 = vadd.f32 %v1728_v28, %v4471_v32 }
 0x5e2   :  { %3904 = vtanh.f32 %v1729_v49 }
 0x5ec   :  { %v3905_v59 = vpop.eup %3904 }
 0x5ed   :  { %v1732_v4 = vmul.f32 %v3905_v59, %v1731_v55 }
 0x5ef   :  { %v4631_v6 = vadd.f32 %v1733_v5, %v1732_v4 }
 0x5f1   :  { %1801 = vmatmul.mubr.f32.vlgmr.msra.gmra.mrb[24].mxu0 %v4631_v6  ;;  %3024 = vmatmul.mubr.f32.vlgmr.msra.gmra.mrb[40].mxu1 %v4631_v6 }
 0x5f2   :  { %3597 = vmatpush1.bf16.msra.mxu0 %v4305_v15  ;;  %3628 = vmatpush3.bf16.msra.mxu1 %v4309_v21 }
 0x5f3   :  { %3599 = vmatprep.subr.bf16.mxu0 %v4307_v16  ;;  %3629 = vmatprep.subr.bf16.mxu1 %v4075_v61 }
 0x5f4   :  { %1963 = vmatprep.mubr.f32.mxu0 %v4073_v1  ;;  %3058 = vmatprep.mubr.msk.f32.mxu1 %vm4076_vm14, %v4073_v1 }
 0x5f6   :  { %3601 = vmatpush1.bf16.msra.mxu0 %v4318_v22  ;;  %3631 = vmatpush3.bf16.msra.mxu1 %v4339_v36 }
 0x5f7   :  { %3603 = vmatprep.subr.bf16.mxu0 %v4322_v23  ;;  %3632 = vmatprep.subr.bf16.mxu1 %v4075_v61 }
 0x5fa   :  { %3605 = vmatpush1.bf16.msra.mxu0 %v4332_v30  ;;  %3634 = vmatpush3.bf16.msra.mxu1 %v4355_v45 }
 0x5fb   :  { %3607 = vmatprep.subr.bf16.mxu0 %v4336_v31  ;;  %3635 = vmatprep.subr.bf16.mxu1 %v4075_v61 }
 0x5fe   :  { %3609 = vmatpush1.bf16.msra.mxu0 %v4348_v39  ;;  %3637 = vmatpush3.bf16.msra.mxu1 %v4370_v47 }
 0x5ff   :  { %3611 = vmatprep.subr.bf16.mxu0 %v4352_v40  ;;  %3638 = vmatprep.subr.bf16.mxu1 %v4075_v61 }
 0x602   :  { %3613 = vmatpush1.bf16.msra.mxu0 %v4363_v50  ;;  %3640 = vmatpush3.bf16.msra.mxu1 %v4385_v60 }
 0x603   :  { %3615 = vmatprep.subr.bf16.mxu0 %v4366_v51  ;;  %3641 = vmatprep.subr.bf16.mxu1 %v4075_v61 }
 0x606   :  { %3617 = vmatpush1.bf16.msra.mxu0 %v4379_v62  ;;  %3643 = vmatpush3.bf16.msra.mxu1 %v4398_v13 }
 0x607   :  { %3619 = vmatprep.subr.bf16.mxu0 %v4382_v0  ;;  %3644 = vmatprep.subr.bf16.mxu1 %v4075_v61 }
 0x60a   :  { %3621 = vmatpush1.bf16.msra.mxu0 %v4392_v9  ;;  %3646 = vmatpush3.bf16.msra.mxu1 %v4409_v18 }
 0x60b   :  { %3623 = vmatprep.subr.bf16.mxu0 %v4395_v10  ;;  %3647 = vmatprep.subr.bf16.mxu1 %v4075_v61 }
 0x60e   :  { %3625 = vmatpush1.bf16.msra.mxu0 %v4405_v17  ;;  %3649 = vmatpush3.bf16.msra.mxu1 %v4418_v20 }
 0x60f   :  { %3651 = vmatprep.subr.bf16.mxu0 %v4286_v56  ;;  %3682 = vmatprep.subr.bf16.mxu1 %v4075_v61 }
 0x6c4   :  { %v1802_v32 = vpop.f32.mrb[24].mxu0  ;;  %v1873_v7 = vpop.f32.mrb[40].mxu1 }
 0x6c5   :  { %v3803_v8 = vadd.f32 %v4488_v57, %v1802_v32  ;;  %v1804_v11 = vpop.f32.mrb[25].mxu0  ;;  %v3025_v12 = vpop.f32.mrb[41].mxu1  ;;  %v1874_v19 = vadd.f32 %v1873_v7, %v4496_v25 }
 0x6c6   :  { %v3805_v35 = vadd.f32 %v4490_v3, %v1804_v11 }
 0x6c7   :  { %v2554_v58 = vmul.f32 -1.442695, %v3803_v8 }
 0x6c8   :  { %v2555_v2 = vmul.f32 -1.442695, %v3805_v35 }
 0x6c9   :  { %3906 = vpow2.f32 %v2554_v58 }
 0x6ca   :  { %3908 = vpow2.f32 %v2555_v2 }
 0x6d3   :  { %v3907_v26 = vpop.eup %3906 }
 0x6d4   :  { %v1881_v29 = vadd.f32 1.0, %v3907_v26  ;;  %v3909_v34 = vpop.eup %3908 }
 0x6d5   :  { %v1888_v37 = vadd.f32 1.0, %v3909_v34 }
 0x6d6   :  { %3910 = vrcp.f32 %v1881_v29 }
 0x6d7   :  { %3912 = vrcp.f32 %v1888_v37 }
 0x6e0   :  { %v3911_v44 = vpop.eup %3910 }
 0x6e1   :  { %v1891_v27 = vmul.f32 %v3911_v44, %v1874_v19  ;;  %v3913_v43 = vpop.eup %3912 }
 0x6e2   :  { %v1894_v52 = vsub.f32 1.0, %v3913_v43  ;;  %v1896_v28 = vmul.f32 %v3913_v43, %v4631_v6  ;;  %v2392_v43 = vld [vmem:[#allocation8 + $0x18] sm:$0xff] }
 0x6e3   :  { %v1892_v33 = vadd.f32 %v1891_v27, %v4477_v42 }
 0x6e5   :  { %3914 = vtanh.f32 %v1892_v33 }
 0x6ef   :  { %v3915_v63 = vpop.eup %3914 }
 0x6f0   :  { %v1895_v24 = vmul.f32 %v3915_v63, %v1894_v52  ;;  %v2393_v63 = vld [vmem:[#allocation8 + $0x20] sm:$0xff] }
 0x6f2   :  { %v4675_v49 = vadd.f32 %v1896_v28, %v1895_v24  ;;  %v2394_v24 = vld [vmem:[#allocation8 + $0x28] sm:$0xff] }
 0x6f3   :  { %v3769_v28 = vpack.c.bf16 %v2394_v24, %v2393_v63 }
 0x6f4   :  { %1964 = vmatmul.mubr.f32.vlgmr.msra.gmra.mrb[26].mxu0 %v4675_v49  ;;  %3059 = vmatmul.mubr.f32.vlgmr.msra.gmra.mrb[42].mxu1 %v4675_v49 }
 0x6f5   :  { %3653 = vmatpush1.bf16.msra.mxu0 %v4305_v15  ;;  %3684 = vmatpush3.bf16.msra.mxu1 %v4309_v21 }
 0x6f6   :  { %3655 = vmatprep.subr.bf16.mxu0 %v4307_v16  ;;  %3685 = vmatprep.subr.bf16.mxu1 %v4075_v61 }
 0x6f7   :  { %2126 = vmatprep.mubr.f32.mxu0 %v4073_v1  ;;  %3093 = vmatprep.mubr.msk.f32.mxu1 %vm4076_vm14, %v4073_v1 }
 0x6f9   :  { %3657 = vmatpush1.bf16.msra.mxu0 %v4318_v22  ;;  %3687 = vmatpush3.bf16.msra.mxu1 %v4339_v36 }
 0x6fa   :  { %3659 = vmatprep.subr.bf16.mxu0 %v4322_v23  ;;  %3688 = vmatprep.subr.bf16.mxu1 %v4075_v61 }
 0x6fd   :  { %3661 = vmatpush1.bf16.msra.mxu0 %v4332_v30  ;;  %3690 = vmatpush3.bf16.msra.mxu1 %v4355_v45 }
 0x6fe   :  { %3663 = vmatprep.subr.bf16.mxu0 %v4336_v31  ;;  %3691 = vmatprep.subr.bf16.mxu1 %v4075_v61 }
 0x701   :  { %3665 = vmatpush1.bf16.msra.mxu0 %v4348_v39  ;;  %3693 = vmatpush3.bf16.msra.mxu1 %v4370_v47 }
 0x702   :  { %3667 = vmatprep.subr.bf16.mxu0 %v4352_v40  ;;  %3694 = vmatprep.subr.bf16.mxu1 %v4075_v61 }
 0x705   :  { %3669 = vmatpush1.bf16.msra.mxu0 %v4363_v50  ;;  %3696 = vmatpush3.bf16.msra.mxu1 %v4385_v60 }
 0x706   :  { %3671 = vmatprep.subr.bf16.mxu0 %v4366_v51  ;;  %3697 = vmatprep.subr.bf16.mxu1 %v4075_v61 }
 0x709   :  { %3673 = vmatpush1.bf16.msra.mxu0 %v4379_v62  ;;  %3699 = vmatpush3.bf16.msra.mxu1 %v4398_v13 }
 0x70a   :  { %3675 = vmatprep.subr.bf16.mxu0 %v4382_v0  ;;  %3700 = vmatprep.subr.bf16.mxu1 %v4075_v61 }
 0x70d   :  { %3677 = vmatpush1.bf16.msra.mxu0 %v4392_v9  ;;  %3702 = vmatpush3.bf16.msra.mxu1 %v4409_v18 }
 0x70e   :  { %3679 = vmatprep.subr.bf16.mxu0 %v4395_v10  ;;  %3703 = vmatprep.subr.bf16.mxu1 %v4075_v61 }
 0x711   :  { %3681 = vmatpush1.bf16.msra.mxu0 %v4405_v17  ;;  %3705 = vmatpush3.bf16.msra.mxu1 %v4418_v20 }
 0x712   :  { %3707 = vmatprep.subr.bf16.mxu0 %v4286_v56  ;;  %3738 = vmatprep.subr.bf16.mxu1 %v4075_v61 }
 0x7c7   :  { %v1965_v42 = vpop.f32.mrb[26].mxu0  ;;  %v2036_v53 = vpop.f32.mrb[42].mxu1 }
 0x7c8   :  { %v3807_v55 = vadd.f32 %v4488_v57, %v1965_v42  ;;  %v1967_v59 = vpop.f32.mrb[27].mxu0  ;;  %v3060_v4 = vpop.f32.mrb[43].mxu1  ;;  %v2037_v56 = vadd.f32 %v2036_v53, %v4496_v25  ;;  %v2395_v42 = vld [vmem:[#allocation8 + $0x30] sm:$0xff] }
 0x7c9   :  { %v3809_v32 = vadd.f32 %v4490_v3, %v1967_v59  ;;  %v2398_v59 = vld [vmem:[#allocation8 + $0x48] sm:$0xff] }
 0x7ca   :  { %v2556_v5 = vmul.f32 -1.442695, %v3807_v55  ;;  %v2397_v55 = vld [vmem:[#allocation8 + $0x40] sm:$0xff] }
 0x7cb   :  { %v2557_v7 = vmul.f32 -1.442695, %v3809_v32  ;;  %v3775_v4 = vpack.c.bf16 %v2398_v59, %v2397_v55  ;;  %v2400_v32 = vld [vmem:[#allocation8 + $0x58] sm:$0xff] }
 0x7cc   :  { %3916 = vpow2.f32 %v2556_v5  ;;  %v2399_v5 = vld [vmem:[#allocation8 + $0x50] sm:$0xff] }
 0x7cd   :  { %3918 = vpow2.f32 %v2557_v7  ;;  %v3778_v7 = vpack.c.bf16 %v2400_v32, %v2399_v5 }
 0x7d6   :  { %v3917_v8 = vpop.eup %3916 }
 0x7d7   :  { %v2044_v11 = vadd.f32 1.0, %v3917_v8  ;;  %v3919_v12 = vpop.eup %3918  ;;  %v2401_v8 = vld [vmem:[#allocation8 + $0x60] sm:$0xff] }
 0x7d8   :  { %v2051_v58 = vadd.f32 1.0, %v3919_v12 }
 0x7d9   :  { %3920 = vrcp.f32 %v2044_v11  ;;  %v2402_v11 = vld [vmem:[#allocation8 + $0x68] sm:$0xff] }
 0x7da   :  { %3922 = vrcp.f32 %v2051_v58  ;;  %v3781_v12 = vpack.c.bf16 %v2402_v11, %v2401_v8  ;;  %v2403_v58 = vld [vmem:[#allocation8 + $0x70] sm:$0xff] }
 0x7e3   :  { %v3921_v35 = vpop.eup %3920 }
 0x7e4   :  { %v2054_v2 = vmul.f32 %v3921_v35, %v2037_v56  ;;  %v3923_v29 = vpop.eup %3922  ;;  %v2404_v56 = vld [vmem:[#allocation8 + $0x78] sm:$0xff] }
 0x7e5   :  { %v2057_v34 = vsub.f32 1.0, %v3923_v29  ;;  %v2059_v44 = vmul.f32 %v3923_v29, %v4675_v49  ;;  %v3784_v35 = vpack.c.bf16 %v2404_v56, %v2403_v58 }
 0x7e6   :  { %v2055_v26 = vadd.f32 %v2054_v2, %v4475_v46  ;;  %v2390_v46 = vld [vmem:[#allocation8 + $0x8] sm:$0xff] }
 0x7e8   :  { %3924 = vtanh.f32 %v2055_v26 }
 0x7f2   :  { %v3925_v37 = vpop.eup %3924 }
 0x7f3   :  { %v2058_v19 = vmul.f32 %v3925_v37, %v2057_v34 }
 0x7f5   :  { %v4719_v27 = vadd.f32 %v2059_v44, %v2058_v19 }
 0x7f7   :  { %2127 = vmatmul.mubr.f32.vlgmr.msra.gmra.mrb[28].mxu0 %v4719_v27  ;;  %3094 = vmatmul.mubr.f32.vlgmr.msra.gmra.mrb[44].mxu1 %v4719_v27 }
 0x7f8   :  { %3709 = vmatpush1.bf16.msra.mxu0 %v4305_v15  ;;  %3740 = vmatpush3.bf16.msra.mxu1 %v4309_v21 }
 0x7f9   :  { %3711 = vmatprep.subr.bf16.mxu0 %v4307_v16  ;;  %3741 = vmatprep.subr.bf16.mxu1 %v4075_v61 }
 0x7fa   :  { %2289 = vmatprep.mubr.f32.mxu0 %v4073_v1  ;;  %3128 = vmatprep.mubr.msk.f32.mxu1 %vm4076_vm14, %v4073_v1 }
 0x7fc   :  { %3713 = vmatpush1.bf16.msra.mxu0 %v4318_v22  ;;  %3743 = vmatpush3.bf16.msra.mxu1 %v4339_v36 }
 0x7fd   :  { %3715 = vmatprep.subr.bf16.mxu0 %v4322_v23  ;;  %3744 = vmatprep.subr.bf16.mxu1 %v4075_v61 }
 0x800   :  { %3717 = vmatpush1.bf16.msra.mxu0 %v4332_v30  ;;  %3746 = vmatpush3.bf16.msra.mxu1 %v4355_v45 }
 0x801   :  { %3719 = vmatprep.subr.bf16.mxu0 %v4336_v31  ;;  %3747 = vmatprep.subr.bf16.mxu1 %v4075_v61 }
 0x804   :  { %3721 = vmatpush1.bf16.msra.mxu0 %v4348_v39  ;;  %3749 = vmatpush3.bf16.msra.mxu1 %v4370_v47 }
 0x805   :  { %3723 = vmatprep.subr.bf16.mxu0 %v4352_v40  ;;  %3750 = vmatprep.subr.bf16.mxu1 %v4075_v61 }
 0x808   :  { %3725 = vmatpush1.bf16.msra.mxu0 %v4363_v50  ;;  %3752 = vmatpush3.bf16.msra.mxu1 %v4385_v60 }
 0x809   :  { %3727 = vmatprep.subr.bf16.mxu0 %v4366_v51  ;;  %3753 = vmatprep.subr.bf16.mxu1 %v4075_v61 }
 0x80c   :  { %3729 = vmatpush1.bf16.msra.mxu0 %v4379_v62  ;;  %3755 = vmatpush3.bf16.msra.mxu1 %v4398_v13 }
 0x80d   :  { %3731 = vmatprep.subr.bf16.mxu0 %v4382_v0  ;;  %3756 = vmatprep.subr.bf16.mxu1 %v4075_v61 }
 0x810   :  { %3733 = vmatpush1.bf16.msra.mxu0 %v4392_v9  ;;  %3758 = vmatpush3.bf16.msra.mxu1 %v4409_v18 }
 0x811   :  { %3735 = vmatprep.subr.bf16.mxu0 %v4395_v10  ;;  %3759 = vmatprep.subr.bf16.mxu1 %v4075_v61 }
 0x814   :  { %3737 = vmatpush1.bf16.msra.mxu0 %v4405_v17  ;;  %3761 = vmatpush3.bf16.msra.mxu1 %v4418_v20  ;;  %v2389_v20 = vld [vmem:[#allocation8] sm:$0xff] }
 0x815   :  { %3762 = vmatprep.subr.bf16.mxu1 %v4075_v61  ;;  %v3763_v33 = vpack.c.bf16 %v2390_v46, %v2389_v20 }
 0x8ca   :  { %v2128_v15 = vpop.f32.mrb[28].mxu0  ;;  %v2199_v16 = vpop.f32.mrb[44].mxu1 }
 0x8cb   :  { %v3811_v21 = vadd.f32 %v4488_v57, %v2128_v15  ;;  %v2130_v22 = vpop.f32.mrb[29].mxu0  ;;  %v3095_v23 = vpop.f32.mrb[45].mxu1  ;;  %v2200_v51 = vadd.f32 %v2199_v16, %v4496_v25 }
 0x8cc   :  { %v3813_v31 = vadd.f32 %v4490_v3, %v2130_v22 }
 0x8cd   :  { %v2558_v30 = vmul.f32 -1.442695, %v3811_v21 }
 0x8ce   :  { %v2559_v36 = vmul.f32 -1.442695, %v3813_v31 }
 0x8cf   :  { %3926 = vpow2.f32 %v2558_v30 }
 0x8d0   :  { %3928 = vpow2.f32 %v2559_v36  ;;  %v1409_v36 = vadd.f32 %v4543_v41, %v4499_v54  ;;  %v2562_v54 = vld [vmem:[%s4809_s7] ss:$0 sm:$0xff] }
 0x8d9   :  { %v3927_v39 = vpop.eup %3926 }
 0x8da   :  { %v2207_v40 = vadd.f32 1.0, %v3927_v39  ;;  %v3929_v45 = vpop.eup %3928 }
 0x8db   :  { %v2214_v50 = vadd.f32 1.0, %v3929_v45 }
 0x8dc   :  { %3930 = vrcp.f32 %v2207_v40 }
 0x8dd   :  { %3932 = vrcp.f32 %v2214_v50 }
 0x8e6   :  { %v3931_v47 = vpop.eup %3930 }
 0x8e7   :  { %v2217_v62 = vmul.f32 %v3931_v47, %v2200_v51  ;;  %v3933_v60 = vpop.eup %3932 }
 0x8e8   :  { %v2220_v9 = vsub.f32 1.0, %v3933_v60  ;;  %v2222_v17 = vmul.f32 %v3933_v60, %v4719_v27 }
 0x8e9   :  { %v2218_v0 = vadd.f32 %v2217_v62, %v4481_v38  ;;  %v2391_v38 = vld [vmem:[#allocation8 + $0x10] sm:$0xff] }
 0x8ea   :  { %v3766_v52 = vpack.c.bf16 %v2392_v43, %v2391_v38 }
 0x8eb   :  { %3934 = vtanh.f32 %v2218_v0 }
 0x8f5   :  { %v3935_v10 = vpop.eup %3934 }
 0x8f6   :  { %v2221_v13 = vmul.f32 %v3935_v10, %v2220_v9 }
 0x8f8   :  { %v4762_v18 = vadd.f32 %v2222_v17, %v2221_v13 }
 0x8fa   :  { %2290 = vmatmul.mubr.f32.vlgmr.msra.gmra.mrb[30].mxu0 %v4762_v18  ;;  %3129 = vmatmul.mubr.f32.vlgmr.msra.gmra.mrb[46].mxu1 %v4762_v18 }
 0x8fb   :  { %3163 = vmatprep.mubr.msk.f32.mxu1 %vm4076_vm14, %v4073_v1  ;;  %3764 = vmatpush3.bf16.msra.mxu1 %v3763_v33  ;;  %v2396_v1 = vld [vmem:[#allocation8 + $0x38] sm:$0xff] }
 0x8fc   :  { %3765 = vmatprep.subr.bf16.mxu1 %v4075_v61  ;;  %v3772_v53 = vpack.c.bf16 %v2396_v1, %v2395_v42 }
 0x8ff   :  { %3767 = vmatpush3.bf16.msra.mxu1 %v3766_v52 }
 0x900   :  { %3768 = vmatprep.subr.bf16.mxu1 %v4075_v61 }
 0x903   :  { %3770 = vmatpush3.bf16.msra.mxu1 %v3769_v28 }
 0x904   :  { %3771 = vmatprep.subr.bf16.mxu1 %v4075_v61 }
 0x907   :  { %3773 = vmatpush3.bf16.msra.mxu1 %v3772_v53 }
 0x908   :  { %3774 = vmatprep.subr.bf16.mxu1 %v4075_v61 }
 0x90b   :  { %3776 = vmatpush3.bf16.msra.mxu1 %v3775_v4 }
 0x90c   :  { %3777 = vmatprep.subr.bf16.mxu1 %v4075_v61 }
 0x90f   :  { %3779 = vmatpush3.bf16.msra.mxu1 %v3778_v7 }
 0x910   :  { %3780 = vmatprep.subr.bf16.mxu1 %v4075_v61 }
 0x913   :  { %3782 = vmatpush3.bf16.msra.mxu1 %v3781_v12 }
 0x914   :  { %3783 = vmatprep.subr.bf16.mxu1 %v4075_v61 }
 0x917   :  { %3785 = vmatpush3.bf16.msra.mxu1 %v3784_v35 }
 0x9cd   :  { %v2291_v2 = vpop.f32.mrb[30].mxu0  ;;  %v2362_v26 = vpop.f32.mrb[46].mxu1 }
 0x9ce   :  { %v3815_v29 = vadd.f32 %v4488_v57, %v2291_v2  ;;  %v2293_v34 = vpop.f32.mrb[31].mxu0  ;;  %v3130_v37 = vpop.f32.mrb[47].mxu1  ;;  %v2363_v61 = vadd.f32 %v2362_v26, %v4496_v25 }
 0x9cf   :  { %v3817_v44 = vadd.f32 %v4490_v3, %v2293_v34  ;;  %v1572_v3 = vadd.f32 %v4587_v14, %v1409_v36 }
 0x9d0   :  { %v2560_v19 = vmul.f32 -1.442695, %v3815_v29 }
 0x9d1   :  { %v2561_v15 = vmul.f32 -1.442695, %v3817_v44  ;;  %v1735_v40 = vadd.f32 %v4631_v6, %v1572_v3 }
 0x9d2   :  { %3936 = vpow2.f32 %v2560_v19 }
 0x9d3   :  { %3938 = vpow2.f32 %v2561_v15  ;;  %v1898_v45 = vadd.f32 %v4675_v49, %v1735_v40 }
 0x9d5   :  { %v2061_v25 = vadd.f32 %v4719_v27, %v1898_v45 }
 0x9dc   :  { %v3937_v16 = vpop.eup %3936 }
 0x9dd   :  { %v2370_v21 = vadd.f32 1.0, %v3937_v16  ;;  %v3939_v22 = vpop.eup %3938 }
 0x9de   :  { %v2377_v23 = vadd.f32 1.0, %v3939_v22 }
 0x9df   :  { %3940 = vrcp.f32 %v2370_v21 }
 0x9e0   :  { %3942 = vrcp.f32 %v2377_v23 }
 0x9e9   :  { %v3941_v30 = vpop.eup %3940 }
 0x9ea   :  { %v2380_v31 = vmul.f32 %v3941_v30, %v2363_v61  ;;  %v3943_v39 = vpop.eup %3942 }
 0x9eb   :  { %v2383_v50 = vsub.f32 1.0, %v3943_v39  ;;  %v2385_v62 = vmul.f32 %v3943_v39, %v4762_v18 }
 0x9ec   :  { %v2381_v57 = vadd.f32 %v2380_v31, %v4479_v48  ;;  %v2224_v48 = vadd.f32 %v4762_v18, %v2061_v25 }
 0x9ee   :  { %3944 = vtanh.f32 %v2381_v57 }
 0x9f8   :  { %v3945_v51 = vpop.eup %3944 }
 0x9f9   :  { %v2384_v47 = vmul.f32 %v3945_v51, %v2383_v50 }
 0x9fb   :  { %v2386_v0 = vadd.f32 %v2385_v62, %v2384_v47 }
 0x9fd   :  { %v2387_v60 = vadd.f32 %v2386_v0, %v2224_v48 }
 0x9ff   :  { %v2388_v9 = vmul.f32 0.125, %v2387_v60 }
 0xa01   :  { %3164 = vmatmul.mubr.f32.vlgmr.msra.gmra.mrb[48].mxu1 %v2388_v9 }
 0xad4   :  { %v2478_v41 = vpop.f32.mrb[48].mxu1 }
 0xad5   :  { %v2479_v14 = vadd.f32 %v2562_v54, %v2478_v41  ;;  %v3165_v6 = vpop.f32.mrb[49].mxu1 }
 0xad7   :  { %2482 = vst [vmem:[#allocation10] sm:$0xff] %v2479_v14 }
 0xad8   :  { %4045 = shalt.err (!%p4042_p8)
}
 0xad9   :  { %s4046_s18 = scalar_lea.hbm %s4810_s8, 128 }
 0xada   :  { %p4047_p9 = scmp.ne.s32.totalorder %s4810_s8, %s4046_s18  ;;  %p4050_p10 = scmp.lt.u32.totalorder %s4046_s18, %s4810_s8 }
 0xadc   :  { %p4052_p11 = pnand %p4050_p10, %p4047_p9 }
 0xade   :  { %4055 = shalt.err (!%p4052_p11)
}
 0xadf   :  { %2492 = dma.vmem_to_hbm [thread:$0]  %s2490_s2, 128, %s4810_s8, [#allocation4]  }
 0xae0   :  { %4062 = dma.done.wait [#allocation4], 128  }
 0xae1   :  { %4063 = vsyncadd [#allocation4], 4294967168 }
 0xae2   :  { %2496 = vsyncpa [#allocation3], 1 }
 0xae3   :  { %2497 = vsyncpa [#allocation6], 1 }
 0xae4   :  { %2498 = vsyncpa [#allocation9], 1 }
 0xae5   :  { %2499 = vsyncpa [#allocation4], 1 }

</bundles_post_ra>
